<compile_context>
chip_gen: v7x
topology: tpu7x:2x2x1
jax: 0.10.0
libtpu: 0.0.40
codegen_flags: <defaults>
</compile_context>

<pallas_src>
import functools

import jax
import jax.numpy as jnp
from jax.experimental import pallas as pl
from jax.experimental.pallas import tpu as pltpu


def mha_kernel(x_ref, wqk_ref, bqk_ref, wproj_ref, bproj_ref, o_ref,
               *, num_heads, head_dim, scale):
    """One batch-block per grid step.

    x_ref:     (Bb, N, E)  input tokens (f32)
    wqk_ref:   (E, 2E)     fused/permuted q|k projection weights (bf16)
    bqk_ref:   (1, 2E)     f32 bias
    wproj_ref: (E, E)      output projection weights, transposed (bf16)
    bproj_ref: (1, E)      f32 bias
    o_ref:     (Bb, N, E)
    """
    Bb, N, E = x_ref.shape
    D = head_dim
    assert E == num_heads * D

    # ---- fused Q|K projection: all batch rows folded into the matmul M dim ----
    # reshape is a free view because N % 8 == 0; bf16 operands -> full MXU rate,
    # f32 accumulate.
    x2 = x_ref[...].reshape(Bb * N, E).astype(jnp.bfloat16)
    qk = jnp.dot(x2, wqk_ref[...], preferred_element_type=jnp.float32)
    qk = qk + bqk_ref[...]                                        # f32 bias add
    # One bf16 cast feeding every downstream MXU consumer (halves the per-head
    # slice relayout bytes and live vregs).
    qk3 = qk.reshape(Bb, N, 2 * E).astype(jnp.bfloat16)           # (Bb, N, 2E)

    # ---- per-head attention (static unrolled; contexts consumed immediately) ----
    ctx_heads = []
    for h in range(num_heads):
        lo = h * D
        q = qk3[:, :, lo:lo + D]                # (Bb, N, D) bf16
        k = qk3[:, :, E + lo:E + lo + D]        # (Bb, N, D) bf16

        # energy[b, n, m] = q[b, n, :] . k[b, m, :]  (batched, no explicit transpose)
        energy = jnp.einsum('bnd,bmd->bnm', q, k,
                            preferred_element_type=jnp.float32)   # (Bb, N, N) f32

        # f32 softmax; the post-softmax 1/sqrt(E) scale is folded into the
        # normalisation.  EUP approx reciprocal + one Newton step keeps the divide
        # off the VALU slot while restoring ~f32 accuracy.
        m = jnp.max(energy, axis=-1, keepdims=True)
        p = jnp.exp(energy - m)
        denom = jnp.sum(p, axis=-1, keepdims=True) * scale
        r = pl.reciprocal(denom, approx=True)
        r = r * (2.0 - denom * r)               # Newton-Raphson refinement
        att = (p * r).astype(jnp.bfloat16)

        # values == keys in the reference module (the 'v' slice is never used).
        ctx_h = jnp.einsum('bnm,bmd->bnd', att, k,
                           preferred_element_type=jnp.float32)    # (Bb, N, D)
        ctx_heads.append(ctx_h.astype(jnp.bfloat16))

    # Single lane-dim concatenate -> one K=128 projection matmul streaming M once.
    ctx = jnp.concatenate(ctx_heads, axis=-1).reshape(Bb * N, E)  # (Bb*N, E) bf16

    out = jnp.dot(ctx, wproj_ref[...], preferred_element_type=jnp.float32)
    out = out + bproj_ref[...]
    o_ref[...] = out.reshape(Bb, N, E).astype(o_ref.dtype)


def _pick_batch_block(B, N, E, vmem_budget_bytes=24 * 1024 * 1024):
    """Largest divisor of B whose working set fits the VMEM budget, preferring
    >= 2 grid steps so the batch axis double-buffers (v5e/v6e) and shards across
    the two TensorCores (v7x)."""
    def fits(bb):
        io_block = bb * N * E * 4             # f32 x / o block
        qk = bb * N * 2 * E * 4               # f32 qk intermediate
        att = bb * N * N * 4                  # per-head f32 energy / p tile
        return 2 * 2 * io_block + qk + 2 * att <= vmem_budget_bytes

    divisors = [d for d in range(1, B + 1) if B % d == 0]
    pipelined = [d for d in divisors if fits(d) and (B == 1 or d <= B // 2)]
    if pipelined:
        return max(pipelined)
    fitting = [d for d in divisors if fits(d)]
    return max(fitting) if fitting else 1


def multi_head_attention(x, W_qkv, b_qkv, W_proj, b_proj, num_heads,
                         batch_block=None):
    """Pallas implementation of MultiHeadAttention.forward (mask=None path)."""
    B, N, E = x.shape
    D = E // num_heads
    assert num_heads * D == E
    # Free-view reshapes in the kernel require N to respect (8,128) sublane tiling.
    # TODO(synk): pad N in the wrapper (e.g. ViT N=197 -> 200) before calling.
    assert N % 8 == 0, "token count must be a multiple of 8 (pad in the wrapper)"

    if batch_block is None:
        batch_block = _pick_batch_block(B, N, E)
    assert B % batch_block == 0
    grid_b = B // batch_block

    # --- parameter glue (plain JAX, one-time) -------------------------------
    # Original qkv output column j decodes as (h, d, c) with c = j % 3 (qkv fastest).
    # Build a permutation so the kernel sees [all q cols | all k cols], each in
    # (h d) order.  The 'v' columns (c == 2) are dropped because values == keys.
    h_idx = jnp.arange(num_heads)[:, None]
    d_idx = jnp.arange(D)[None, :]
    q_cols = (h_idx * D * 3 + d_idx * 3).reshape(-1)       # c == 0
    perm = jnp.concatenate([q_cols, q_cols + 1])            # q cols, then k cols

    Wqk = W_qkv[perm, :].T.astype(jnp.bfloat16)   # (E, 2E) bf16 weights for the MXU
    bqk = b_qkv[perm][None, :].astype(jnp.float32)  # (1, 2E) f32 bias
    Wp = W_proj.T.astype(jnp.bfloat16)            # (E, E)
    bp = b_proj[None, :].astype(jnp.float32)      # (1, E)
    scale = float(E) ** 0.5

    kernel = functools.partial(mha_kernel, num_heads=num_heads, head_dim=D,
                               scale=scale)

    return pl.pallas_call(
        kernel,
        out_shape=jax.ShapeDtypeStruct((B, N, E), x.dtype),
        grid_spec=pltpu.PrefetchScalarGridSpec(
            num_scalar_prefetch=0,
            grid=(grid_b,),
            in_specs=[
                pl.BlockSpec((batch_block, N, E), lambda b: (b, 0, 0)),  # x rows
                pl.BlockSpec((E, 2 * E), lambda b: (0, 0)),              # Wqk (resident)
                pl.BlockSpec((1, 2 * E), lambda b: (0, 0)),              # bqk
                pl.BlockSpec((E, E), lambda b: (0, 0)),                  # Wproj
                pl.BlockSpec((1, E), lambda b: (0, 0)),                  # bproj
            ],
            out_specs=pl.BlockSpec((batch_block, N, E), lambda b: (b, 0, 0)),
        ),
        compiler_params=pltpu.CompilerParams(
            dimension_semantics=("parallel",),
            vmem_limit_bytes=32 * 1024 * 1024),
    )(x, Wqk, bqk, Wp, bp)


def ref_forward(x, W_qkv, b_qkv, W_proj, b_proj, num_heads):
    """Pure-JAX transcription of the PyTorch forward (mask=None), for checking."""
    B, N, E = x.shape
    D = E // num_heads
    qkv = x @ W_qkv.T + b_qkv                               # (B, N, 3E)
    qkv = qkv.reshape(B, N, num_heads, D, 3)                # 'b n (h d qkv)'
    qkv = jnp.transpose(qkv, (4, 0, 2, 1, 3))               # 'qkv b h n d'
    q, k = qkv[0], qkv[1]
    v = qkv[1]                                              # values = qkv[1] (!)
    energy = jnp.einsum('bhqd,bhkd->bhqk', q, k)
    att = jax.nn.softmax(energy, axis=-1) / (E ** 0.5)
    out = jnp.einsum('bhal,bhlv->bhav', att, v)
    out = jnp.transpose(out, (0, 2, 1, 3)).reshape(B, N, E)  # 'b h n d -> b n (h d)'
    return out @ W_proj.T + b_proj


if __name__ == "__main__":
    # Small shapes consistent with the module: embedded_patches -> E, 8 heads.
    B, N, E, H = 2, 16, 128, 8

    key = jax.random.PRNGKey(0)
    kx, k1, k2, k3, k4 = jax.random.split(key, 5)
    x = jax.random.normal(kx, (B, N, E), dtype=jnp.float32)
    # Deterministic synthetic parameters (shapes from __init__):
    W_qkv = jax.random.normal(k1, (3 * E, E), dtype=jnp.float32) * (1.0 / E ** 0.5)
    b_qkv = jax.random.normal(k2, (3 * E,), dtype=jnp.float32) * 0.01
    W_proj = jax.random.normal(k3, (E, E), dtype=jnp.float32) * (1.0 / E ** 0.5)
    b_proj = jax.random.normal(k4, (E,), dtype=jnp.float32) * 0.01
    # nn.LayerNorm(E) params exist in the module but LN(x) is unused in forward.

    out = multi_head_attention(x, W_qkv, b_qkv, W_proj, b_proj, H)
    out = jax.block_until_ready(out)

    ref = ref_forward(x, W_qkv, b_qkv, W_proj, b_proj, H)
    max_err = float(jnp.max(jnp.abs(out - ref)))
    # Tolerance covers bf16 MXU operands (dominant error term) + EUP reciprocal
    # (refined with one Newton step).
    assert jnp.allclose(out, ref, atol=5e-2, rtol=5e-2), f"max_err={max_err}"

    print("KERNEL_OK")
</pallas_src>

<mosaic_0001>
module attributes {stable_mosaic.version = 11 : i64} {
  func.func @mha_kernel(%arg0: i32, %arg1: memref<1x16x128xf32, #tpu.memory_space<vmem>>, %arg2: memref<128x256xbf16, #tpu.memory_space<vmem>>, %arg3: memref<1x256xf32, #tpu.memory_space<vmem>>, %arg4: memref<128x128xbf16, #tpu.memory_space<vmem>>, %arg5: memref<1x128xf32, #tpu.memory_space<vmem>>, %arg6: memref<1x16x128xf32, #tpu.memory_space<vmem>>) attributes {dimension_semantics = [#tpu.dimension_semantics<parallel>], iteration_bounds = array<i64: 2>, scalar_prefetch = 0 : i64, scratch_operands = 0 : i64, tpu.core_type = #tpu.core_type<tc>, window_params = [{transform_indices = @transform_0, window_bounds = array<i64: 1, 16, 128>}, {pipeline_mode = #tpu.pipeline_mode<synchronous>, transform_indices = @transform_1, window_bounds = array<i64: 128, 256>}, {pipeline_mode = #tpu.pipeline_mode<synchronous>, transform_indices = @transform_2, window_bounds = array<i64: 1, 256>}, {pipeline_mode = #tpu.pipeline_mode<synchronous>, transform_indices = @transform_3, window_bounds = array<i64: 128, 128>}, {pipeline_mode = #tpu.pipeline_mode<synchronous>, transform_indices = @transform_4, window_bounds = array<i64: 1, 128>}, {transform_indices = @transform_5, window_bounds = array<i64: 1, 16, 128>}]} {
    %c0 = arith.constant 0 : index
    %c0_0 = arith.constant 0 : index
    %c0_1 = arith.constant 0 : index
    %0 = vector.load %arg1[%c0, %c0_0, %c0_1] : memref<1x16x128xf32, #tpu.memory_space<vmem>>, vector<1x16x128xf32>
    %1 = vector.shape_cast %0 : vector<1x16x128xf32> to vector<16x128xf32>
    %2 = arith.truncf %1 : vector<16x128xf32> to vector<16x128xbf16>
    %c0_2 = arith.constant 0 : index
    %c0_3 = arith.constant 0 : index
    %3 = vector.load %arg2[%c0_2, %c0_3] : memref<128x256xbf16, #tpu.memory_space<vmem>>, vector<128x256xbf16>
    %cst = arith.constant dense<0.000000e+00> : vector<16x256xf32>
    %4 = tpu.matmul %2, %3, %cst {dimension_numbers = #tpu.dot_dimension_numbers<[1], [0], [0], [1], [0, 0, 1, 1], [], []>} : vector<16x128xbf16>, vector<128x256xbf16>, vector<16x256xf32> -> vector<16x256xf32>
    %c0_4 = arith.constant 0 : index
    %c0_5 = arith.constant 0 : index
    %5 = vector.load %arg3[%c0_4, %c0_5] : memref<1x256xf32, #tpu.memory_space<vmem>>, vector<1x256xf32>
    %6 = vector.broadcast %5 : vector<1x256xf32> to vector<16x256xf32>
    %7 = arith.addf %4, %6 : vector<16x256xf32>
    %8 = vector.shape_cast %7 : vector<16x256xf32> to vector<1x16x256xf32>
    %9 = arith.truncf %8 : vector<1x16x256xf32> to vector<1x16x256xbf16>
    %10 = vector.extract_strided_slice %9 {offsets = [0, 0, 0], sizes = [1, 16, 16], strides = [1, 1, 1]} : vector<1x16x256xbf16> to vector<1x16x16xbf16>
    %11 = vector.extract_strided_slice %9 {offsets = [0, 0, 128], sizes = [1, 16, 16], strides = [1, 1, 1]} : vector<1x16x256xbf16> to vector<1x16x16xbf16>
    "tpu.trace_start"() <{level = 10 : i32, message = "bnd,bmd->bnm"}> : () -> ()
    %cst_6 = arith.constant dense<0.000000e+00> : vector<1x16x16xf32>
    %12 = tpu.matmul %10, %11, %cst_6 {dimension_numbers = #tpu.dot_dimension_numbers<[2], [2], [1], [1], [0, 0, 0, 1, 1, 1], [0], [0]>} : vector<1x16x16xbf16>, vector<1x16x16xbf16>, vector<1x16x16xf32> -> vector<1x16x16xf32>
    "tpu.trace_stop"() : () -> ()
    %cst_7 = arith.constant dense<0xFF800000> : vector<1x16xf32>
    %13 = vector.multi_reduction <maximumf>, %12, %cst_7 [2] : vector<1x16x16xf32> to vector<1x16xf32>
    %14 = vector.shape_cast %13 : vector<1x16xf32> to vector<1x16x1xf32>
    %15 = vector.broadcast %14 : vector<1x16x1xf32> to vector<1x16x16xf32>
    %16 = arith.subf %12, %15 : vector<1x16x16xf32>
    %17 = math.exp %16 : vector<1x16x16xf32>
    %cst_8 = arith.constant dense<0.000000e+00> : vector<1x16xf32>
    %18 = vector.multi_reduction <add>, %17, %cst_8 [2] : vector<1x16x16xf32> to vector<1x16xf32>
    %19 = vector.shape_cast %18 : vector<1x16xf32> to vector<1x16x1xf32>
    %cst_9 = arith.constant 11.3137083 : f32
    %20 = vector.broadcast %cst_9 : f32 to vector<1x16x1xf32>
    %21 = arith.mulf %19, %20 : vector<1x16x1xf32>
    %22 = tpu.reciprocal %21 {approx = true} : vector<1x16x1xf32> -> vector<1x16x1xf32>
    %23 = arith.mulf %21, %22 : vector<1x16x1xf32>
    %cst_10 = arith.constant 2.000000e+00 : f32
    %24 = vector.broadcast %cst_10 : f32 to vector<1x16x1xf32>
    %25 = arith.subf %24, %23 : vector<1x16x1xf32>
    %26 = arith.mulf %22, %25 : vector<1x16x1xf32>
    %27 = vector.broadcast %26 : vector<1x16x1xf32> to vector<1x16x16xf32>
    %28 = arith.mulf %17, %27 : vector<1x16x16xf32>
    %29 = arith.truncf %28 : vector<1x16x16xf32> to vector<1x16x16xbf16>
    "tpu.trace_start"() <{level = 10 : i32, message = "bnm,bmd->bnd"}> : () -> ()
    %cst_11 = arith.constant dense<0.000000e+00> : vector<1x16x16xf32>
    %30 = tpu.matmul %29, %11, %cst_11 {dimension_numbers = #tpu.dot_dimension_numbers<[2], [1], [1], [2], [0, 0, 0, 1, 1, 2], [0], [0]>} : vector<1x16x16xbf16>, vector<1x16x16xbf16>, vector<1x16x16xf32> -> vector<1x16x16xf32>
    "tpu.trace_stop"() : () -> ()
    %31 = arith.truncf %30 : vector<1x16x16xf32> to vector<1x16x16xbf16>
    %32 = vector.extract_strided_slice %9 {offsets = [0, 0, 16], sizes = [1, 16, 16], strides = [1, 1, 1]} : vector<1x16x256xbf16> to vector<1x16x16xbf16>
    %33 = vector.extract_strided_slice %9 {offsets = [0, 0, 144], sizes = [1, 16, 16], strides = [1, 1, 1]} : vector<1x16x256xbf16> to vector<1x16x16xbf16>
    "tpu.trace_start"() <{level = 10 : i32, message = "bnd,bmd->bnm"}> : () -> ()
    %cst_12 = arith.constant dense<0.000000e+00> : vector<1x16x16xf32>
    %34 = tpu.matmul %32, %33, %cst_12 {dimension_numbers = #tpu.dot_dimension_numbers<[2], [2], [1], [1], [0, 0, 0, 1, 1, 1], [0], [0]>} : vector<1x16x16xbf16>, vector<1x16x16xbf16>, vector<1x16x16xf32> -> vector<1x16x16xf32>
    "tpu.trace_stop"() : () -> ()
    %cst_13 = arith.constant dense<0xFF800000> : vector<1x16xf32>
    %35 = vector.multi_reduction <maximumf>, %34, %cst_13 [2] : vector<1x16x16xf32> to vector<1x16xf32>
    %36 = vector.shape_cast %35 : vector<1x16xf32> to vector<1x16x1xf32>
    %37 = vector.broadcast %36 : vector<1x16x1xf32> to vector<1x16x16xf32>
    %38 = arith.subf %34, %37 : vector<1x16x16xf32>
    %39 = math.exp %38 : vector<1x16x16xf32>
    %cst_14 = arith.constant dense<0.000000e+00> : vector<1x16xf32>
    %40 = vector.multi_reduction <add>, %39, %cst_14 [2] : vector<1x16x16xf32> to vector<1x16xf32>
    %41 = vector.shape_cast %40 : vector<1x16xf32> to vector<1x16x1xf32>
    %cst_15 = arith.constant 11.3137083 : f32
    %42 = vector.broadcast %cst_15 : f32 to vector<1x16x1xf32>
    %43 = arith.mulf %41, %42 : vector<1x16x1xf32>
    %44 = tpu.reciprocal %43 {approx = true} : vector<1x16x1xf32> -> vector<1x16x1xf32>
    %45 = arith.mulf %43, %44 : vector<1x16x1xf32>
    %cst_16 = arith.constant 2.000000e+00 : f32
    %46 = vector.broadcast %cst_16 : f32 to vector<1x16x1xf32>
    %47 = arith.subf %46, %45 : vector<1x16x1xf32>
    %48 = arith.mulf %44, %47 : vector<1x16x1xf32>
    %49 = vector.broadcast %48 : vector<1x16x1xf32> to vector<1x16x16xf32>
    %50 = arith.mulf %39, %49 : vector<1x16x16xf32>
    %51 = arith.truncf %50 : vector<1x16x16xf32> to vector<1x16x16xbf16>
    "tpu.trace_start"() <{level = 10 : i32, message = "bnm,bmd->bnd"}> : () -> ()
    %cst_17 = arith.constant dense<0.000000e+00> : vector<1x16x16xf32>
    %52 = tpu.matmul %51, %33, %cst_17 {dimension_numbers = #tpu.dot_dimension_numbers<[2], [1], [1], [2], [0, 0, 0, 1, 1, 2], [0], [0]>} : vector<1x16x16xbf16>, vector<1x16x16xbf16>, vector<1x16x16xf32> -> vector<1x16x16xf32>
    "tpu.trace_stop"() : () -> ()
    %53 = arith.truncf %52 : vector<1x16x16xf32> to vector<1x16x16xbf16>
    %54 = vector.extract_strided_slice %9 {offsets = [0, 0, 32], sizes = [1, 16, 16], strides = [1, 1, 1]} : vector<1x16x256xbf16> to vector<1x16x16xbf16>
    %55 = vector.extract_strided_slice %9 {offsets = [0, 0, 160], sizes = [1, 16, 16], strides = [1, 1, 1]} : vector<1x16x256xbf16> to vector<1x16x16xbf16>
    "tpu.trace_start"() <{level = 10 : i32, message = "bnd,bmd->bnm"}> : () -> ()
    %cst_18 = arith.constant dense<0.000000e+00> : vector<1x16x16xf32>
    %56 = tpu.matmul %54, %55, %cst_18 {dimension_numbers = #tpu.dot_dimension_numbers<[2], [2], [1], [1], [0, 0, 0, 1, 1, 1], [0], [0]>} : vector<1x16x16xbf16>, vector<1x16x16xbf16>, vector<1x16x16xf32> -> vector<1x16x16xf32>
    "tpu.trace_stop"() : () -> ()
    %cst_19 = arith.constant dense<0xFF800000> : vector<1x16xf32>
    %57 = vector.multi_reduction <maximumf>, %56, %cst_19 [2] : vector<1x16x16xf32> to vector<1x16xf32>
    %58 = vector.shape_cast %57 : vector<1x16xf32> to vector<1x16x1xf32>
    %59 = vector.broadcast %58 : vector<1x16x1xf32> to vector<1x16x16xf32>
    %60 = arith.subf %56, %59 : vector<1x16x16xf32>
    %61 = math.exp %60 : vector<1x16x16xf32>
    %cst_20 = arith.constant dense<0.000000e+00> : vector<1x16xf32>
    %62 = vector.multi_reduction <add>, %61, %cst_20 [2] : vector<1x16x16xf32> to vector<1x16xf32>
    %63 = vector.shape_cast %62 : vector<1x16xf32> to vector<1x16x1xf32>
    %cst_21 = arith.constant 11.3137083 : f32
    %64 = vector.broadcast %cst_21 : f32 to vector<1x16x1xf32>
    %65 = arith.mulf %63, %64 : vector<1x16x1xf32>
    %66 = tpu.reciprocal %65 {approx = true} : vector<1x16x1xf32> -> vector<1x16x1xf32>
    %67 = arith.mulf %65, %66 : vector<1x16x1xf32>
    %cst_22 = arith.constant 2.000000e+00 : f32
    %68 = vector.broadcast %cst_22 : f32 to vector<1x16x1xf32>
    %69 = arith.subf %68, %67 : vector<1x16x1xf32>
    %70 = arith.mulf %66, %69 : vector<1x16x1xf32>
    %71 = vector.broadcast %70 : vector<1x16x1xf32> to vector<1x16x16xf32>
    %72 = arith.mulf %61, %71 : vector<1x16x16xf32>
    %73 = arith.truncf %72 : vector<1x16x16xf32> to vector<1x16x16xbf16>
    "tpu.trace_start"() <{level = 10 : i32, message = "bnm,bmd->bnd"}> : () -> ()
    %cst_23 = arith.constant dense<0.000000e+00> : vector<1x16x16xf32>
    %74 = tpu.matmul %73, %55, %cst_23 {dimension_numbers = #tpu.dot_dimension_numbers<[2], [1], [1], [2], [0, 0, 0, 1, 1, 2], [0], [0]>} : vector<1x16x16xbf16>, vector<1x16x16xbf16>, vector<1x16x16xf32> -> vector<1x16x16xf32>
    "tpu.trace_stop"() : () -> ()
    %75 = arith.truncf %74 : vector<1x16x16xf32> to vector<1x16x16xbf16>
    %76 = vector.extract_strided_slice %9 {offsets = [0, 0, 48], sizes = [1, 16, 16], strides = [1, 1, 1]} : vector<1x16x256xbf16> to vector<1x16x16xbf16>
    %77 = vector.extract_strided_slice %9 {offsets = [0, 0, 176], sizes = [1, 16, 16], strides = [1, 1, 1]} : vector<1x16x256xbf16> to vector<1x16x16xbf16>
    "tpu.trace_start"() <{level = 10 : i32, message = "bnd,bmd->bnm"}> : () -> ()
    %cst_24 = arith.constant dense<0.000000e+00> : vector<1x16x16xf32>
    %78 = tpu.matmul %76, %77, %cst_24 {dimension_numbers = #tpu.dot_dimension_numbers<[2], [2], [1], [1], [0, 0, 0, 1, 1, 1], [0], [0]>} : vector<1x16x16xbf16>, vector<1x16x16xbf16>, vector<1x16x16xf32> -> vector<1x16x16xf32>
    "tpu.trace_stop"() : () -> ()
    %cst_25 = arith.constant dense<0xFF800000> : vector<1x16xf32>
    %79 = vector.multi_reduction <maximumf>, %78, %cst_25 [2] : vector<1x16x16xf32> to vector<1x16xf32>
    %80 = vector.shape_cast %79 : vector<1x16xf32> to vector<1x16x1xf32>
    %81 = vector.broadcast %80 : vector<1x16x1xf32> to vector<1x16x16xf32>
    %82 = arith.subf %78, %81 : vector<1x16x16xf32>
    %83 = math.exp %82 : vector<1x16x16xf32>
    %cst_26 = arith.constant dense<0.000000e+00> : vector<1x16xf32>
    %84 = vector.multi_reduction <add>, %83, %cst_26 [2] : vector<1x16x16xf32> to vector<1x16xf32>
    %85 = vector.shape_cast %84 : vector<1x16xf32> to vector<1x16x1xf32>
    %cst_27 = arith.constant 11.3137083 : f32
    %86 = vector.broadcast %cst_27 : f32 to vector<1x16x1xf32>
    %87 = arith.mulf %85, %86 : vector<1x16x1xf32>
    %88 = tpu.reciprocal %87 {approx = true} : vector<1x16x1xf32> -> vector<1x16x1xf32>
    %89 = arith.mulf %87, %88 : vector<1x16x1xf32>
    %cst_28 = arith.constant 2.000000e+00 : f32
    %90 = vector.broadcast %cst_28 : f32 to vector<1x16x1xf32>
    %91 = arith.subf %90, %89 : vector<1x16x1xf32>
    %92 = arith.mulf %88, %91 : vector<1x16x1xf32>
    %93 = vector.broadcast %92 : vector<1x16x1xf32> to vector<1x16x16xf32>
    %94 = arith.mulf %83, %93 : vector<1x16x16xf32>
    %95 = arith.truncf %94 : vector<1x16x16xf32> to vector<1x16x16xbf16>
    "tpu.trace_start"() <{level = 10 : i32, message = "bnm,bmd->bnd"}> : () -> ()
    %cst_29 = arith.constant dense<0.000000e+00> : vector<1x16x16xf32>
    %96 = tpu.matmul %95, %77, %cst_29 {dimension_numbers = #tpu.dot_dimension_numbers<[2], [1], [1], [2], [0, 0, 0, 1, 1, 2], [0], [0]>} : vector<1x16x16xbf16>, vector<1x16x16xbf16>, vector<1x16x16xf32> -> vector<1x16x16xf32>
    "tpu.trace_stop"() : () -> ()
    %97 = arith.truncf %96 : vector<1x16x16xf32> to vector<1x16x16xbf16>
    %98 = vector.extract_strided_slice %9 {offsets = [0, 0, 64], sizes = [1, 16, 16], strides = [1, 1, 1]} : vector<1x16x256xbf16> to vector<1x16x16xbf16>
    %99 = vector.extract_strided_slice %9 {offsets = [0, 0, 192], sizes = [1, 16, 16], strides = [1, 1, 1]} : vector<1x16x256xbf16> to vector<1x16x16xbf16>
    "tpu.trace_start"() <{level = 10 : i32, message = "bnd,bmd->bnm"}> : () -> ()
    %cst_30 = arith.constant dense<0.000000e+00> : vector<1x16x16xf32>
    %100 = tpu.matmul %98, %99, %cst_30 {dimension_numbers = #tpu.dot_dimension_numbers<[2], [2], [1], [1], [0, 0, 0, 1, 1, 1], [0], [0]>} : vector<1x16x16xbf16>, vector<1x16x16xbf16>, vector<1x16x16xf32> -> vector<1x16x16xf32>
    "tpu.trace_stop"() : () -> ()
    %cst_31 = arith.constant dense<0xFF800000> : vector<1x16xf32>
    %101 = vector.multi_reduction <maximumf>, %100, %cst_31 [2] : vector<1x16x16xf32> to vector<1x16xf32>
    %102 = vector.shape_cast %101 : vector<1x16xf32> to vector<1x16x1xf32>
    %103 = vector.broadcast %102 : vector<1x16x1xf32> to vector<1x16x16xf32>
    %104 = arith.subf %100, %103 : vector<1x16x16xf32>
    %105 = math.exp %104 : vector<1x16x16xf32>
    %cst_32 = arith.constant dense<0.000000e+00> : vector<1x16xf32>
    %106 = vector.multi_reduction <add>, %105, %cst_32 [2] : vector<1x16x16xf32> to vector<1x16xf32>
    %107 = vector.shape_cast %106 : vector<1x16xf32> to vector<1x16x1xf32>
    %cst_33 = arith.constant 11.3137083 : f32
    %108 = vector.broadcast %cst_33 : f32 to vector<1x16x1xf32>
    %109 = arith.mulf %107, %108 : vector<1x16x1xf32>
    %110 = tpu.reciprocal %109 {approx = true} : vector<1x16x1xf32> -> vector<1x16x1xf32>
    %111 = arith.mulf %109, %110 : vector<1x16x1xf32>
    %cst_34 = arith.constant 2.000000e+00 : f32
    %112 = vector.broadcast %cst_34 : f32 to vector<1x16x1xf32>
    %113 = arith.subf %112, %111 : vector<1x16x1xf32>
    %114 = arith.mulf %110, %113 : vector<1x16x1xf32>
    %115 = vector.broadcast %114 : vector<1x16x1xf32> to vector<1x16x16xf32>
    %116 = arith.mulf %105, %115 : vector<1x16x16xf32>
    %117 = arith.truncf %116 : vector<1x16x16xf32> to vector<1x16x16xbf16>
    "tpu.trace_start"() <{level = 10 : i32, message = "bnm,bmd->bnd"}> : () -> ()
    %cst_35 = arith.constant dense<0.000000e+00> : vector<1x16x16xf32>
    %118 = tpu.matmul %117, %99, %cst_35 {dimension_numbers = #tpu.dot_dimension_numbers<[2], [1], [1], [2], [0, 0, 0, 1, 1, 2], [0], [0]>} : vector<1x16x16xbf16>, vector<1x16x16xbf16>, vector<1x16x16xf32> -> vector<1x16x16xf32>
    "tpu.trace_stop"() : () -> ()
    %119 = arith.truncf %118 : vector<1x16x16xf32> to vector<1x16x16xbf16>
    %120 = vector.extract_strided_slice %9 {offsets = [0, 0, 80], sizes = [1, 16, 16], strides = [1, 1, 1]} : vector<1x16x256xbf16> to vector<1x16x16xbf16>
    %121 = vector.extract_strided_slice %9 {offsets = [0, 0, 208], sizes = [1, 16, 16], strides = [1, 1, 1]} : vector<1x16x256xbf16> to vector<1x16x16xbf16>
    "tpu.trace_start"() <{level = 10 : i32, message = "bnd,bmd->bnm"}> : () -> ()
    %cst_36 = arith.constant dense<0.000000e+00> : vector<1x16x16xf32>
    %122 = tpu.matmul %120, %121, %cst_36 {dimension_numbers = #tpu.dot_dimension_numbers<[2], [2], [1], [1], [0, 0, 0, 1, 1, 1], [0], [0]>} : vector<1x16x16xbf16>, vector<1x16x16xbf16>, vector<1x16x16xf32> -> vector<1x16x16xf32>
    "tpu.trace_stop"() : () -> ()
    %cst_37 = arith.constant dense<0xFF800000> : vector<1x16xf32>
    %123 = vector.multi_reduction <maximumf>, %122, %cst_37 [2] : vector<1x16x16xf32> to vector<1x16xf32>
    %124 = vector.shape_cast %123 : vector<1x16xf32> to vector<1x16x1xf32>
    %125 = vector.broadcast %124 : vector<1x16x1xf32> to vector<1x16x16xf32>
    %126 = arith.subf %122, %125 : vector<1x16x16xf32>
    %127 = math.exp %126 : vector<1x16x16xf32>
    %cst_38 = arith.constant dense<0.000000e+00> : vector<1x16xf32>
    %128 = vector.multi_reduction <add>, %127, %cst_38 [2] : vector<1x16x16xf32> to vector<1x16xf32>
    %129 = vector.shape_cast %128 : vector<1x16xf32> to vector<1x16x1xf32>
    %cst_39 = arith.constant 11.3137083 : f32
    %130 = vector.broadcast %cst_39 : f32 to vector<1x16x1xf32>
    %131 = arith.mulf %129, %130 : vector<1x16x1xf32>
    %132 = tpu.reciprocal %131 {approx = true} : vector<1x16x1xf32> -> vector<1x16x1xf32>
    %133 = arith.mulf %131, %132 : vector<1x16x1xf32>
    %cst_40 = arith.constant 2.000000e+00 : f32
    %134 = vector.broadcast %cst_40 : f32 to vector<1x16x1xf32>
    %135 = arith.subf %134, %133 : vector<1x16x1xf32>
    %136 = arith.mulf %132, %135 : vector<1x16x1xf32>
    %137 = vector.broadcast %136 : vector<1x16x1xf32> to vector<1x16x16xf32>
    %138 = arith.mulf %127, %137 : vector<1x16x16xf32>
    %139 = arith.truncf %138 : vector<1x16x16xf32> to vector<1x16x16xbf16>
    "tpu.trace_start"() <{level = 10 : i32, message = "bnm,bmd->bnd"}> : () -> ()
    %cst_41 = arith.constant dense<0.000000e+00> : vector<1x16x16xf32>
    %140 = tpu.matmul %139, %121, %cst_41 {dimension_numbers = #tpu.dot_dimension_numbers<[2], [1], [1], [2], [0, 0, 0, 1, 1, 2], [0], [0]>} : vector<1x16x16xbf16>, vector<1x16x16xbf16>, vector<1x16x16xf32> -> vector<1x16x16xf32>
    "tpu.trace_stop"() : () -> ()
    %141 = arith.truncf %140 : vector<1x16x16xf32> to vector<1x16x16xbf16>
    %142 = vector.extract_strided_slice %9 {offsets = [0, 0, 96], sizes = [1, 16, 16], strides = [1, 1, 1]} : vector<1x16x256xbf16> to vector<1x16x16xbf16>
    %143 = vector.extract_strided_slice %9 {offsets = [0, 0, 224], sizes = [1, 16, 16], strides = [1, 1, 1]} : vector<1x16x256xbf16> to vector<1x16x16xbf16>
    "tpu.trace_start"() <{level = 10 : i32, message = "bnd,bmd->bnm"}> : () -> ()
    %cst_42 = arith.constant dense<0.000000e+00> : vector<1x16x16xf32>
    %144 = tpu.matmul %142, %143, %cst_42 {dimension_numbers = #tpu.dot_dimension_numbers<[2], [2], [1], [1], [0, 0, 0, 1, 1, 1], [0], [0]>} : vector<1x16x16xbf16>, vector<1x16x16xbf16>, vector<1x16x16xf32> -> vector<1x16x16xf32>
    "tpu.trace_stop"() : () -> ()
    %cst_43 = arith.constant dense<0xFF800000> : vector<1x16xf32>
    %145 = vector.multi_reduction <maximumf>, %144, %cst_43 [2] : vector<1x16x16xf32> to vector<1x16xf32>
    %146 = vector.shape_cast %145 : vector<1x16xf32> to vector<1x16x1xf32>
    %147 = vector.broadcast %146 : vector<1x16x1xf32> to vector<1x16x16xf32>
    %148 = arith.subf %144, %147 : vector<1x16x16xf32>
    %149 = math.exp %148 : vector<1x16x16xf32>
    %cst_44 = arith.constant dense<0.000000e+00> : vector<1x16xf32>
    %150 = vector.multi_reduction <add>, %149, %cst_44 [2] : vector<1x16x16xf32> to vector<1x16xf32>
    %151 = vector.shape_cast %150 : vector<1x16xf32> to vector<1x16x1xf32>
    %cst_45 = arith.constant 11.3137083 : f32
    %152 = vector.broadcast %cst_45 : f32 to vector<1x16x1xf32>
    %153 = arith.mulf %151, %152 : vector<1x16x1xf32>
    %154 = tpu.reciprocal %153 {approx = true} : vector<1x16x1xf32> -> vector<1x16x1xf32>
    %155 = arith.mulf %153, %154 : vector<1x16x1xf32>
    %cst_46 = arith.constant 2.000000e+00 : f32
    %156 = vector.broadcast %cst_46 : f32 to vector<1x16x1xf32>
    %157 = arith.subf %156, %155 : vector<1x16x1xf32>
    %158 = arith.mulf %154, %157 : vector<1x16x1xf32>
    %159 = vector.broadcast %158 : vector<1x16x1xf32> to vector<1x16x16xf32>
    %160 = arith.mulf %149, %159 : vector<1x16x16xf32>
    %161 = arith.truncf %160 : vector<1x16x16xf32> to vector<1x16x16xbf16>
    "tpu.trace_start"() <{level = 10 : i32, message = "bnm,bmd->bnd"}> : () -> ()
    %cst_47 = arith.constant dense<0.000000e+00> : vector<1x16x16xf32>
    %162 = tpu.matmul %161, %143, %cst_47 {dimension_numbers = #tpu.dot_dimension_numbers<[2], [1], [1], [2], [0, 0, 0, 1, 1, 2], [0], [0]>} : vector<1x16x16xbf16>, vector<1x16x16xbf16>, vector<1x16x16xf32> -> vector<1x16x16xf32>
    "tpu.trace_stop"() : () -> ()
    %163 = arith.truncf %162 : vector<1x16x16xf32> to vector<1x16x16xbf16>
    %164 = vector.extract_strided_slice %9 {offsets = [0, 0, 112], sizes = [1, 16, 16], strides = [1, 1, 1]} : vector<1x16x256xbf16> to vector<1x16x16xbf16>
    %165 = vector.extract_strided_slice %9 {offsets = [0, 0, 240], sizes = [1, 16, 16], strides = [1, 1, 1]} : vector<1x16x256xbf16> to vector<1x16x16xbf16>
    "tpu.trace_start"() <{level = 10 : i32, message = "bnd,bmd->bnm"}> : () -> ()
    %cst_48 = arith.constant dense<0.000000e+00> : vector<1x16x16xf32>
    %166 = tpu.matmul %164, %165, %cst_48 {dimension_numbers = #tpu.dot_dimension_numbers<[2], [2], [1], [1], [0, 0, 0, 1, 1, 1], [0], [0]>} : vector<1x16x16xbf16>, vector<1x16x16xbf16>, vector<1x16x16xf32> -> vector<1x16x16xf32>
    "tpu.trace_stop"() : () -> ()
    %cst_49 = arith.constant dense<0xFF800000> : vector<1x16xf32>
    %167 = vector.multi_reduction <maximumf>, %166, %cst_49 [2] : vector<1x16x16xf32> to vector<1x16xf32>
    %168 = vector.shape_cast %167 : vector<1x16xf32> to vector<1x16x1xf32>
    %169 = vector.broadcast %168 : vector<1x16x1xf32> to vector<1x16x16xf32>
    %170 = arith.subf %166, %169 : vector<1x16x16xf32>
    %171 = math.exp %170 : vector<1x16x16xf32>
    %cst_50 = arith.constant dense<0.000000e+00> : vector<1x16xf32>
    %172 = vector.multi_reduction <add>, %171, %cst_50 [2] : vector<1x16x16xf32> to vector<1x16xf32>
    %173 = vector.shape_cast %172 : vector<1x16xf32> to vector<1x16x1xf32>
    %cst_51 = arith.constant 11.3137083 : f32
    %174 = vector.broadcast %cst_51 : f32 to vector<1x16x1xf32>
    %175 = arith.mulf %173, %174 : vector<1x16x1xf32>
    %176 = tpu.reciprocal %175 {approx = true} : vector<1x16x1xf32> -> vector<1x16x1xf32>
    %177 = arith.mulf %175, %176 : vector<1x16x1xf32>
    %cst_52 = arith.constant 2.000000e+00 : f32
    %178 = vector.broadcast %cst_52 : f32 to vector<1x16x1xf32>
    %179 = arith.subf %178, %177 : vector<1x16x1xf32>
    %180 = arith.mulf %176, %179 : vector<1x16x1xf32>
    %181 = vector.broadcast %180 : vector<1x16x1xf32> to vector<1x16x16xf32>
    %182 = arith.mulf %171, %181 : vector<1x16x16xf32>
    %183 = arith.truncf %182 : vector<1x16x16xf32> to vector<1x16x16xbf16>
    "tpu.trace_start"() <{level = 10 : i32, message = "bnm,bmd->bnd"}> : () -> ()
    %cst_53 = arith.constant dense<0.000000e+00> : vector<1x16x16xf32>
    %184 = tpu.matmul %183, %165, %cst_53 {dimension_numbers = #tpu.dot_dimension_numbers<[2], [1], [1], [2], [0, 0, 0, 1, 1, 2], [0], [0]>} : vector<1x16x16xbf16>, vector<1x16x16xbf16>, vector<1x16x16xf32> -> vector<1x16x16xf32>
    "tpu.trace_stop"() : () -> ()
    %185 = arith.truncf %184 : vector<1x16x16xf32> to vector<1x16x16xbf16>
    %186 = tpu.concatenate %31, %53, %75, %97, %119, %141, %163, %185 in 2 : vector<1x16x16xbf16>, vector<1x16x16xbf16>, vector<1x16x16xbf16>, vector<1x16x16xbf16>, vector<1x16x16xbf16>, vector<1x16x16xbf16>, vector<1x16x16xbf16>, vector<1x16x16xbf16> -> vector<1x16x128xbf16>
    %187 = vector.shape_cast %186 : vector<1x16x128xbf16> to vector<16x128xbf16>
    %c0_54 = arith.constant 0 : index
    %c0_55 = arith.constant 0 : index
    %188 = vector.load %arg4[%c0_54, %c0_55] : memref<128x128xbf16, #tpu.memory_space<vmem>>, vector<128x128xbf16>
    %cst_56 = arith.constant dense<0.000000e+00> : vector<16x128xf32>
    %189 = tpu.matmul %187, %188, %cst_56 {dimension_numbers = #tpu.dot_dimension_numbers<[1], [0], [0], [1], [0, 0, 1, 1], [], []>} : vector<16x128xbf16>, vector<128x128xbf16>, vector<16x128xf32> -> vector<16x128xf32>
    %c0_57 = arith.constant 0 : index
    %c0_58 = arith.constant 0 : index
    %190 = vector.load %arg5[%c0_57, %c0_58] : memref<1x128xf32, #tpu.memory_space<vmem>>, vector<1x128xf32>
    %191 = vector.broadcast %190 : vector<1x128xf32> to vector<16x128xf32>
    %192 = arith.addf %189, %191 : vector<16x128xf32>
    %193 = vector.shape_cast %192 : vector<16x128xf32> to vector<1x16x128xf32>
    %c0_59 = arith.constant 0 : index
    %c0_60 = arith.constant 0 : index
    %c0_61 = arith.constant 0 : index
    %194 = vector.load %arg6[%c0_59, %c0_60, %c0_61] : memref<1x16x128xf32, #tpu.memory_space<vmem>>, vector<1x16x128xf32>
    tpu.vector_store %arg6[%c0_59, %c0_60, %c0_61], %193 {strides = array<i32>} : memref<1x16x128xf32, #tpu.memory_space<vmem>>, vector<1x16x128xf32>,
    return
  }
  func.func @transform_0(%arg0: i32) -> (i32, i32, i32) {
    %c0_i32 = arith.constant 0 : i32
    %c0_i32_0 = arith.constant 0 : i32
    %c0_i32_1 = arith.constant 0 : i32
    return %arg0, %c0_i32, %c0_i32_0 : i32, i32, i32
  }
  func.func @transform_1(%arg0: i32) -> (i32, i32) {
    %c0_i32 = arith.constant 0 : i32
    %c0_i32_0 = arith.constant 0 : i32
    %c0_i32_1 = arith.constant 0 : i32
    return %c0_i32, %c0_i32_0 : i32, i32
  }
  func.func @transform_2(%arg0: i32) -> (i32, i32) {
    %c0_i32 = arith.constant 0 : i32
    %c0_i32_0 = arith.constant 0 : i32
    %c0_i32_1 = arith.constant 0 : i32
    return %c0_i32, %c0_i32_0 : i32, i32
  }
  func.func @transform_3(%arg0: i32) -> (i32, i32) {
    %c0_i32 = arith.constant 0 : i32
    %c0_i32_0 = arith.constant 0 : i32
    %c0_i32_1 = arith.constant 0 : i32
    return %c0_i32, %c0_i32_0 : i32, i32
  }
  func.func @transform_4(%arg0: i32) -> (i32, i32) {
    %c0_i32 = arith.constant 0 : i32
    %c0_i32_0 = arith.constant 0 : i32
    %c0_i32_1 = arith.constant 0 : i32
    return %c0_i32, %c0_i32_0 : i32, i32
  }
  func.func @transform_5(%arg0: i32) -> (i32, i32, i32) {
    %c0_i32 = arith.constant 0 : i32
    %c0_i32_0 = arith.constant 0 : i32
    %c0_i32_1 = arith.constant 0 : i32
    return %arg0, %c0_i32, %c0_i32_0 : i32, i32, i32
  }
}

</mosaic_0001>

<bundles_post_ra>
// kernel: tpu_custom_call.1
= control target key start
LH: loop header
LB: loop body
LE: loop exit
PB: predicated region body
PF: predicated region fallthrough
CT: control target
= control target key end

     0   :  { %10 = vsyncpa [#allocation3], 0  ;;  %s2825_s0 = inlined_call_operand.hbm [shape: f32[2,16,128], index: 0, kind: input, shape index: {}]   ;;  %s2826_s1 = inlined_call_operand.hbm [shape: bf16[128,256], index: 1, kind: input, shape index: {}]   ;;  %s2827_s2 = inlined_call_operand.vmem [shape: f32[1,256], index: 2, kind: input, shape index: {}]   ;;  %s2828_s3 = inlined_call_operand.hbm [shape: bf16[128,128], index: 3, kind: input, shape index: {}]   ;;  %s2829_s4 = inlined_call_operand.vmem [shape: f32[1,128], index: 4, kind: input, shape index: {}]   ;;  %s2830_s5 = inlined_call_operand.hbm [shape: f32[2,16,128], index: 5, kind: output, shape index: {}]  }
   0x1   :  { %12 = vsyncpa [#allocation3 + $0x1], 0 }
   0x2   :  { %13 = vsyncpa [#allocation6], 0 }
   0x3   :  { %14 = vsyncpa [#allocation4], 0 }
   0x4   :  { %16 = vsyncpa [#allocation4 + $0x1], 0  ;;  %s2319_s18 = smov 0   ;;  %s2321_s19 = smov 0  }
   0x5   :  { %s2323_s20 = smov 0   ;;  %s2325_s21 = smov 0  }
   0x6 LB: > { %s2340_s22 = sadd.s32 4294967295, %s2267_s21   ;;  %s1714_s23 = sadd.s32 4294967294, %s2267_s21   ;;  %s2267_s21 = sphi %s2325_s21, %s2850_s21   ;;  %s2263_s20 = sphi %s2323_s20, %s2849_s20   ;;  %s2259_s19 = sphi %s2321_s19, %s2848_s19   ;;  %s2255_s18 = sphi %s2319_s18, %s2847_s18  }
   0x7   : > { %p42_p0 = scmp.ne.s32.totalorder %s2259_s19, %s2255_s18  ;;  %p2831_p1 = scmp.eq.s32.totalorder %s2340_s22, 0 }
   0x8   : > { %p156_p3 = scmp.eq.s32.totalorder %s1714_s23, 1  ;;  %p1715_p5 = scmp.ge.s32.totalorder %s2267_s21, 1 }
   0x9   : > { %p2349_p4 = por %p2831_p1, %p42_p0  ;;  %p163_p7 = scmp.lt.s32.totalorder %s2267_s21, 3 }
   0xa   : > { %p2354_p6 = por %p156_p3, %p42_p0  ;;  %s2269_s27 = smov [#allocation5]  }
   0xb   : > { %s2834_s24 = scalar_select %p2349_p4, 1, 0 }
   0xc   : > { %s2835_s25 = scalar_select %p2354_p6, 1, 0 }
   0xd   : > { %p2359_p8 = pnand %p1715_p5, %p163_p7  ;;  %s175_s28 = sshll.u32 %s2269_s27, 4  ;;  %s2363_s28 = int_to_ptr.vmem [resolvable:$true] %s175_s28 }
   0xe   : > { %s2270_s30 = smov [#allocation7]   ;;  %s2111_s9 = scalar_lea.hbm %s2826_s1, 2048 }
   0xf   : > { %p1944_p9 = pneg %p2359_p8  ;;  %s191_s6 = sshll.u32 %s2270_s30, 4  ;;  %s2374_s6 = int_to_ptr.vmem [resolvable:$true] %s191_s6 }
  0x10   : > { %p2112_p12 = scmp.ne.s32.totalorder %s2826_s1, %s2111_s9  ;;  %p2118_p5 = scmp.lt.u32.totalorder %s2111_s9, %s2826_s1 }
  0x11   : > { %p2370_p11 = pnand %p1944_p9, %p2831_p1 }
  0x13   : > { %p2113_p13 = pneg %p2370_p11 }
  0x15   : > { %p2114_p0 = pnand %p2113_p13, %p2112_p12 }
  0x17   : > { %p2115_p3 = pneg %p2114_p0 }
  0x19   : > { %p2120_p7 = pnand %p2118_p5, %p2115_p3 }
  0x1b   : > { %2123 = shalt.err (!%p2120_p7)
}
  0x1c   : > { %s2124_s14 = scalar_lea.vmem %s2363_s28, 2048  ;;  %p2132_p2 = scmp.lt.s32.totalorder %s2363_s28, %s2363_s28 }
  0x1d   : > { %p2125_p9 = scmp.ne.s32.totalorder %s2363_s28, %s2124_s14  ;;  %p2133_p12 = scmp.lt.s32.totalorder %s2124_s14, %s2124_s14 }
  0x1f   : > { %p2127_p10 = pnand %p2125_p9, %p2113_p13  ;;  %p2134_p0 = por %p2133_p12, %p2132_p2 }
  0x21   : > { %p2128_p1 = pneg %p2127_p10 }
  0x23   : > { %p2135_p6 = pnand %p2134_p0, %p2128_p1 }
  0x25   : > { %2138 = shalt.err (!%p2135_p6)
}
  0x26   : > { %s2271_s15 = smov 128   ;;  %s2272_s16 = smov 8  }
  0x27   : > { %1947 = dma.hbm_to_vmem [thread:$0]  (!%p2370_p11), %s2826_s1, 2048, %s2363_s28, [#allocation6], %s2271_s15, %s2271_s15, %s2272_s16  }
  0x28   : > { %s2139_s7 = scalar_lea.hbm %s2828_s3, 1024 }
  0x29   : > { %p2140_p1 = scmp.ne.s32.totalorder %s2828_s3, %s2139_s7  ;;  %p2146_p10 = scmp.lt.u32.totalorder %s2139_s7, %s2828_s3 }
  0x2b   : > { %p2142_p2 = pnand %p2140_p1, %p2113_p13 }
  0x2d   : > { %p2143_p6 = pneg %p2142_p2 }
  0x2f   : > { %p2148_p3 = pnand %p2146_p10, %p2143_p6 }
  0x31   : > { %2151 = shalt.err (!%p2148_p3)
}
  0x32   : > { %s2152_s28 = scalar_lea.vmem %s2374_s6, 1024  ;;  %p2160_p12 = scmp.lt.s32.totalorder %s2374_s6, %s2374_s6 }
  0x33   : > { %p2153_p5 = scmp.ne.s32.totalorder %s2374_s6, %s2152_s28  ;;  %p2161_p0 = scmp.lt.s32.totalorder %s2152_s28, %s2152_s28 }
  0x35   : > { %p2155_p7 = pnand %p2153_p5, %p2113_p13  ;;  %p2162_p1 = por %p2161_p0, %p2160_p12 }
  0x37   : > { %p2156_p9 = pneg %p2155_p7 }
  0x39   : > { %p2163_p2 = pnand %p2162_p1, %p2156_p9 }
  0x3b   : > { %2166 = shalt.err (!%p2163_p2)
}
  0x3c   : > { %s2273_s12 = smov 64   ;;  %s2274_s13 = smov 4  }
  0x3d   : > { %1950 = dma.hbm_to_vmem [thread:$0]  (!%p2370_p11), %s2828_s3, 1024, %s2374_s6, [#allocation6], %s2273_s12, %s2273_s12, %s2274_s13  }
  0x3e   : > { %s2432_s23 = sadd.s32 1, %s2267_s21   ;;  %s29_s30 = sadd.s32 1, %s2263_s20 }
  0x3f   : > { %s26_s27 = ssub.s32 %s2267_s21, %s2432_s23  ;;  %p36_p6 = scmp.ne.s32.totalorder %s2263_s20, %s2259_s19 }
  0x40   : > { %p27_p13 = scmp.eq.s32.totalorder %s26_s27, 0  ;;  %p37_p10 = scmp.eq.s32.totalorder %s2267_s21, 0 }
  0x41   : > { %p2838_p5 = scmp.eq.s32.totalorder %s2340_s22, 1  ;;  %p1961_p9 = scmp.lt.s32.totalorder %s2267_s21, 2 }
  0x42   : > { %s2441_s7 = scalar_select %p27_p13, %s2263_s20, %s29_s30  }
  0x43   : > { %p38_p3 = por %p37_p10, %p36_p6  ;;  %p2445_p7 = por %p2838_p5, %p36_p6 }
  0x44   : > { %s208_s29 = sand.u32 1, %s2263_s20   ;;  %s1773_s6 = sshll.u32 %s2267_s21, 8 }
  0x45   : > { %s2839_s8 = scalar_select %p2445_p7, 1, 0 }
  0x46   : > { %s1719_s9 = sshll.u32 %s208_s29, 4  ;;  %s2455_s28 = scalar_lea.hbm %s2825_s0, %s1773_s6 }
  0x47   : > { %s212_s12 = scalar_lea.vmem [#allocation2], %s1719_s9  ;;  %p2459_p11 = pnand %p1961_p9, %p38_p3 }
  0x48   : > { %s219_s13 = sshll.u32 %s212_s12, 4  ;;  %s2463_s17 = scalar_lea.sflag [#allocation3], %s208_s29  ;;  %s2457_s13 = int_to_ptr.vmem [resolvable:$true] %s219_s13 }
  0x49   : > { %s2167_s27 = scalar_lea.hbm %s2455_s28, 256  ;;  %p2169_p0 = pneg %p2459_p11 }
  0x4a   : > { %p2168_p12 = scmp.ne.s32.totalorder %s2455_s28, %s2167_s27  ;;  %s2172_s6 = scalar_lea.hbm %s2825_s0, 512 }
  0x4b   : > { %p2173_p13 = scmp.lt.u32.totalorder %s2455_s28, %s2825_s0  ;;  %p2174_p6 = scmp.lt.u32.totalorder %s2172_s6, %s2167_s27 }
  0x4c   : > { %p2170_p1 = pnand %p2169_p0, %p2168_p12  ;;  %p2176_p3 = scmp.lt.u32.totalorder %s2167_s27, %s2455_s28 }
  0x4d   : > { %p2175_p10 = por %p2174_p6, %p2173_p13 }
  0x4e   : > { %p2171_p2 = pneg %p2170_p1 }
  0x4f   : > { %p2177_p5 = por %p2176_p3, %p2175_p10 }
  0x51   : > { %p2178_p9 = pnand %p2177_p5, %p2171_p2 }
  0x53   : > { %2181 = shalt.err (!%p2178_p9)
}
  0x54   : > { %s2182_s29 = scalar_lea.vmem %s2457_s13, 256  ;;  %s2275_s12 = smov [#allocation2]  }
  0x55   : > { %p2183_p12 = scmp.ne.s32.totalorder %s2457_s13, %s2182_s29  ;;  %s2187_s30 = sshll.u32 %s2275_s12, 4  ;;  %s2188_s30 = int_to_ptr.vmem [resolvable:$false] %s2187_s30 }
  0x56   : > { %s2189_s9 = scalar_lea.vmem %s2188_s30, 512  ;;  %p2190_p4 = scmp.lt.s32.totalorder %s2457_s13, %s2188_s30 }
  0x57   : > { %p2185_p1 = pnand %p2183_p12, %p2169_p0  ;;  %p2191_p13 = scmp.lt.s32.totalorder %s2189_s9, %s2182_s29 }
  0x59   : > { %p2186_p7 = pneg %p2185_p1  ;;  %p2192_p6 = por %p2191_p13, %p2190_p4 }
  0x5b   : > { %p2193_p10 = pnand %p2192_p6, %p2186_p7 }
  0x5d   : > { %2196 = shalt.err (!%p2193_p10)
}
  0x5e   : > { %1954 = dma.hbm_to_vmem [thread:$0]  (!%p2459_p11), %s2455_s28, 256, %s2457_s13, %s2463_s17, %s2271_s15, %s2271_s15, %s2272_s16  }
  0x5f   : > { %231 = sbr.rel (%p2359_p8) target bundleno = 3139 (0xc43), region = 40  ;;  %s2497_s27 = sand.u32 (!%p2359_p8), 1, %s2259_s19  }
  0x60   : > { %s1723_s6 = sshll.u32 (!%p2359_p8), %s2497_s27, 4  ;;  %s234_s10 = scalar_lea.sflag (!%p2359_p8), [#allocation3], %s2497_s27 }
  0x61   : > { %s2503_s14 = scalar_lea.vmem (!%p2359_p8), [#allocation2], %s1723_s6  ;;  %p2841_p4 = scmp.ne.s32.totalorder (!%p2359_p8), %s2834_s24, 0 }
  0x66   : > { %2242 = dma.done.wait (%p2841_p4), %s234_s10, 256  }
  0x67   : > { %2244 = vsyncadd (%p2841_p4), %s234_s10, 4294967040  ;;  %p2842_p7 = scmp.eq.s32.totalorder %s2340_s22, 0 }
  0x69   : > { %2246 = dma.done.wait (%p2842_p7), [#allocation6], 3072   ;;  %p2843_p8 = pmov %p2842_p7 }
  0x6a   : > { %v2276_v0 = vmov 0   ;;  %v2015_v1 = vld [vmem:[#allocation5 + $0x4] ss:$8 sps:$4 sm:$0xff]   ;;  %v2017_v2 = vld [vmem:[#allocation5] ss:$8 sps:$4 sm:$0xff]   ;;  %v2277_v20 = vmov 0.0   ;;  %v294_v21 = vlaneseq }
  0x6b   : > { %2248 = vsyncadd (%p2843_p8), [#allocation6], 4294964224  ;;  %416 = vmatprep.mubr.bf16.mxu0 %v2276_v0  ;;  %384 = vmatprep.subr.bf16.mxu0 %v2015_v1  ;;  %v2018_v3 = vld [vmem:[#allocation5 + $0x14] ss:$8 sps:$4 sm:$0xff]   ;;  %v2020_v4 = vld [vmem:[#allocation5 + $0x10] ss:$8 sps:$4 sm:$0xff]  }
  0x6c   : > { %385 = vmatpush1.bf16.msra.mxu0 %v2017_v2  ;;  %v2021_v5 = vld [vmem:[#allocation5 + $0x24] ss:$8 sps:$4 sm:$0xff]   ;;  %v2023_v6 = vld [vmem:[#allocation5 + $0x20] ss:$8 sps:$4 sm:$0xff]   ;;  %v2024_v7 = vld [vmem:[#allocation5 + $0x34] ss:$8 sps:$4 sm:$0xff]   ;;  %1816 = vmatprep.subr.bf16.mxu1 %v2277_v20 }
  0x6d   : > { %386 = vmatprep.subr.bf16.mxu0 %v2018_v3  ;;  %v2026_v8 = vld [vmem:[#allocation5 + $0x30] ss:$8 sps:$4 sm:$0xff]   ;;  %v2027_v9 = vld [vmem:[#allocation5 + $0x44] ss:$8 sps:$4 sm:$0xff]   ;;  %v2029_v10 = vld [vmem:[#allocation5 + $0x40] ss:$8 sps:$4 sm:$0xff]  }
  0x6e   : > { %v2030_v11 = vld [vmem:[#allocation5 + $0x54] ss:$8 sps:$4 sm:$0xff]   ;;  %v2032_v12 = vld [vmem:[#allocation5 + $0x50] ss:$8 sps:$4 sm:$0xff]   ;;  %v2033_v13 = vld [vmem:[#allocation5 + $0x64] ss:$8 sps:$4 sm:$0xff]  }
  0x6f   : > { %v2035_v14 = vld [vmem:[#allocation5 + $0x60] ss:$8 sps:$4 sm:$0xff]   ;;  %v2036_v15 = vld [vmem:[#allocation5 + $0x74] ss:$8 sps:$4 sm:$0xff]   ;;  %v2038_v16 = vld [vmem:[#allocation5 + $0x70] ss:$8 sps:$4 sm:$0xff]  }
  0x70   : > { %387 = vmatpush1.bf16.msra.mxu0 %v2020_v4  ;;  %v273_v17 = vld [vmem:[%s2503_s14] sm:$0xff]  ;;  %v274_v18 = vld [vmem:[%s2503_s14 + $0x8] sm:$0xff]  ;;  %vm2278_vm0 = vmmov 0   ;;  %v295_v22 = vshrl.u32 %v294_v21, 7  ;;  %vm429_vm1 = vcmask 130048   ;;  %s2279_s15 = smov 112  }
  0x71   : > { %388 = vmatprep.subr.bf16.mxu0 %v2021_v5  ;;  %v275_v19 = vpack.c.bf16 %v274_v18, %v273_v17  ;;  %1818 = vmatprep.mubr.msk.bf16.mxu1 %vm2278_vm0, %v2277_v20  ;;  %v292_v24 = vld [vmem:[%s2827_s2] sm:$0x3]  ;;  %s2280_s16 = smov 96   ;;  %s2281_s28 = smov 80   ;;  %vm1475_vm2 = vcmask 261120   ;;  %vm1478_vm3 = vcmask 392192  }
  0x72   : > { %v296_v23 = vsub.s32 0, %v295_v22  ;;  %v300_v25 = vsub.s32 1, %v295_v22  ;;  %s2282_s13 = smov 64   ;;  %s2283_s17 = smov 48   ;;  %vm1481_vm4 = vcmask 523264   ;;  %vm1484_vm5 = vcmask 654336  }
  0x73   : > { %s2284_s11 = smov 32   ;;  %s2285_s29 = smov 16   ;;  %vm1487_vm6 = vcmask 785408   ;;  %vm1490_vm7 = vcmask 916480  }
  0x74   : > { %389 = vmatpush1.bf16.msra.mxu0 %v2023_v6  ;;  %v297_v26 = vrot.slane %v292_v24, %v296_v23  ;;  %v301_v28 = vrot.slane %v292_v24, %v300_v25  ;;  %s271_s9 = scalar_lea.vmem [#allocation8], %s1723_s6  ;;  %s1774_s14 = sshll.u32 %s2340_s22, 8 }
  0x75   : > { %390 = vmatprep.subr.bf16.mxu0 %v2024_v7  ;;  %s1622_s10 = sshll.u32 %s271_s9, 4  ;;  %s1609_s6 = scalar_lea.sflag [#allocation4], %s2497_s27  ;;  %s2776_s10 = int_to_ptr.vmem [resolvable:$true] %s1622_s10 }
  0x76   : > { %s2197_s22 = scalar_lea.vmem %s2776_s10, 256  ;;  %p2844_p0 = scmp.ne.s32.totalorder %s2839_s8, 0 }
  0x77   : > { %p2198_p11 = scmp.ne.s32.totalorder %s2776_s10, %s2197_s22 }
  0x78   : > { %391 = vmatpush1.bf16.msra.mxu0 %v2026_v8 }
  0x79   : > { %392 = vmatprep.subr.bf16.mxu0 %v2027_v9  ;;  %p2199_p2 = pnand %p2198_p11, %p2844_p0 }
  0x7b   : > { %p2200_p3 = pneg %p2199_p2 }
  0x7c   : > { %393 = vmatpush1.bf16.msra.mxu0 %v2029_v10 }
  0x7d   : > { %394 = vmatprep.subr.bf16.mxu0 %v2030_v11 }
  0x80   : > { %395 = vmatpush1.bf16.msra.mxu0 %v2032_v12 }
  0x81   : > { %396 = vmatprep.subr.bf16.mxu0 %v2033_v13 }
  0x84   : > { %397 = vmatpush1.bf16.msra.mxu0 %v2035_v14 }
  0x85   : > { %398 = vmatprep.subr.bf16.mxu0 %v2036_v15 }
  0x88   : > { %399 = vmatpush1.bf16.msra.mxu0 %v2038_v16 }
  0x89   : > { %1864 = vmatprep.subr.bf16.mxu0 %v2277_v20 }
  0x8b   : > { %417 = vmatmul.mubr.bf16.vlgmr.msra.gmra.mrb[0].mxu0 %v275_v19 }
  0x8c   : > { %1866 = vmatprep.mubr.msk.bf16.mxu0 %vm2278_vm0, %v2277_v20 }
 0x15e   : > { %v418_v27 = vpop.f32.mrb[0].mxu0 }
 0x15f   : > { %v420_v29 = vpop.f32.mrb[1].mxu0  ;;  %v419_v31 = vadd.f32 %v418_v27, %v297_v26 }
 0x160   : > { %v422_v30 = vpop.f32.mrb[2].mxu0  ;;  %v421_v34 = vadd.f32 %v420_v29, %v301_v28 }
 0x161   : > { %v423_v32 = vadd.f32 %v422_v30, %v297_v26  ;;  %v424_v33 = vpop.f32.mrb[3].mxu0 }
 0x162   : > { %v425_v35 = vadd.f32 %v424_v33, %v301_v28 }
 0x163   : > { %v2524_v36 = vpack.c.bf16 %v423_v32, %v419_v31 }
 0x164   : > { %v2526_v37 = vpack.c.bf16 %v425_v35, %v421_v34 }
 0x166   : > { %v434_v38 = vsel %vm429_vm1, %v2526_v37, 0 }
 0x167   : > { %1817 = vmatpush3.bf16.xpose.msra.mxu1 %v434_v38 }
 0x168   : > { %1822 = vmatprep.subr.bf16.mxu1 %v2277_v20 }
 0x16e   : > { %1819 = vmatmul.mubr.msk.bf16.vlgmr.msra.gmra.mrb[0].mxu1 %vm429_vm1, %v2524_v36 }
 0x16f   : > { %1823 = vmatpush3.bf16.msra.mxu1 %v2526_v37  ;;  %1824 = vmatprep.mubr.msk.bf16.mxu1 %vm2278_vm0, %v2277_v20 }
 0x170   : > { %1828 = vmatprep.subr.bf16.mxu1 %v2277_v20 }
 0x241   : > { %v470_v39 = vpop.f32.mrb[0].mxu1 }
 0x242   : > { %v1820_v40 = vpop.f32.mrb[1].mxu1  ;;  %v477_v41 = vsel %vm429_vm1, %v470_v39, -inf }
 0x243   : > { %478 = vmax.xlane.f32.xlu0 %v477_v41  ;;  %v473_v42 = vpop.f32.mrb[2].mxu1 }
 0x244   : > { %v1821_v43 = vpop.f32.mrb[3].mxu1  ;;  %v480_v44 = vsel %vm429_vm1, %v473_v42, -inf }
 0x247   : > { %481 = vmax.xlane.f32.xlu0 %v480_v44 }
 0x25d   : > { %557 = vrot.lane.b32.xlu0 %v2526_v37, %s2279_s15 }
 0x2d0   : > { %v479_v45 = vpop.xlane.xlu0 %478 }
 0x2d1   : > { %v483_v46 = vsub.f32 %v470_v39, %v479_v45 }
 0x2d3   : > { %v485_v47 = vmul.f32 1.442695, %v483_v46 }
 0x2d4   : > { %v482_v48 = vpop.xlane.xlu0 %481 }
 0x2d5   : > { %2047 = vpow2.f32 %v485_v47  ;;  %v484_v49 = vsub.f32 %v473_v42, %v482_v48 }
 0x2d7   : > { %v487_v50 = vmul.f32 1.442695, %v484_v49 }
 0x2d8   : > { %v558_v5 = vpop.permute.xlu0 %557 }
 0x2d9   : > { %2049 = vpow2.f32 %v487_v50  ;;  %v563_v7 = vsel %vm429_vm1, %v558_v5, 0 }
 0x2df   : > { %v2048_v51 = vpop.eup %2047 }
 0x2e0   : > { %v489_v52 = vsel %vm429_vm1, %v2048_v51, 0.0 }
 0x2e1   : > { %490 = vadd.xlane.f32.xlu1 %v489_v52 }
 0x2e3   : > { %v2050_v53 = vpop.eup %2049 }
 0x2e4   : > { %v492_v54 = vsel %vm429_vm1, %v2050_v53, 0.0 }
 0x2e5   : > { %493 = vadd.xlane.f32.xlu1 %v492_v54 }
 0x2f6   : > { %554 = vrot.lane.b32.xlu1 %v2524_v36, %s2279_s15 }
 0x36e   : > { %v491_v55 = vpop.xlane.xlu1 %490 }
 0x36f   : > { %v495_v56 = vmul.f32 11.313708, %v491_v55 }
 0x371   : > { %2051 = vrcp.f32 %v495_v56 }
 0x372   : > { %v494_v57 = vpop.xlane.xlu1 %493 }
 0x373   : > { %v496_v58 = vmul.f32 11.313708, %v494_v57 }
 0x375   : > { %2053 = vrcp.f32 %v496_v58 }
 0x376   : > { %v555_v8 = vpop.permute.xlu1 %554 }
 0x37b   : > { %v2052_v59 = vpop.eup %2051 }
 0x37c   : > { %v499_v60 = vmul.f32 %v2052_v59, %v495_v56 }
 0x37e   : > { %v501_v61 = vsub.f32 2.0, %v499_v60 }
 0x37f   : > { %v2054_v62 = vpop.eup %2053 }
 0x380   : > { %v500_v63 = vmul.f32 %v2054_v62, %v496_v58  ;;  %v503_v0 = vmul.f32 %v2052_v59, %v501_v61 }
 0x382   : > { %v502_v1 = vsub.f32 2.0, %v500_v63  ;;  %v505_v3 = vmul.f32 %v2048_v51, %v503_v0 }
 0x384   : > { %v504_v2 = vmul.f32 %v2054_v62, %v502_v1 }
 0x386   : > { %v506_v4 = vmul.f32 %v2050_v53, %v504_v2 }
 0x388   : > { %v507_v6 = vpack.c.bf16 %v506_v4, %v505_v3 }
 0x38a   : > { %1825 = vmatmul.mubr.msk.bf16.vlgmr.msra.gmra.mrb[4].mxu1 %vm429_vm1, %v507_v6 }
 0x38b   : > { %1829 = vmatpush3.bf16.xpose.msra.mxu1 %v563_v7  ;;  %1830 = vmatprep.mubr.msk.bf16.mxu1 %vm2278_vm0, %v2277_v20 }
 0x38c   : > { %1834 = vmatprep.subr.bf16.mxu1 %v2277_v20 }
 0x392   : > { %1831 = vmatmul.mubr.msk.bf16.vlgmr.msra.gmra.mrb[8].mxu1 %vm429_vm1, %v555_v8 }
 0x393   : > { %1835 = vmatpush3.bf16.msra.mxu1 %v558_v5  ;;  %1836 = vmatprep.mubr.msk.bf16.mxu1 %vm2278_vm0, %v2277_v20 }
 0x394   : > { %1840 = vmatprep.subr.bf16.mxu1 %v2277_v20 }
 0x45d   : > { %v2554_v9 = vpop.f32.mrb[4].mxu1 }
 0x45e   : > { %v1826_v10 = vpop.f32.mrb[5].mxu1 }
 0x45f   : > { %v2556_v11 = vpop.f32.mrb[6].mxu1 }
 0x460   : > { %v552_v12 = vpack.c.bf16 %v2556_v11, %v2554_v9  ;;  %v1827_v13 = vpop.f32.mrb[7].mxu1  ;;  %v1759_v11 = vld [vmem:[%s2829_s4] ss:$0 sm:$0xff] }
 0x465   : > { %v599_v14 = vpop.f32.mrb[8].mxu1 }
 0x466   : > { %v1832_v15 = vpop.f32.mrb[9].mxu1  ;;  %v606_v16 = vsel %vm429_vm1, %v599_v14, -inf }
 0x467   : > { %607 = vmax.xlane.f32.xlu1 %v606_v16  ;;  %v602_v17 = vpop.f32.mrb[10].mxu1 }
 0x468   : > { %v1833_v18 = vpop.f32.mrb[11].mxu1  ;;  %v609_v19 = vsel %vm429_vm1, %v602_v17, -inf }
 0x469   : > { %610 = vmax.xlane.f32.xlu0 %v609_v19 }
 0x4f4   : > { %v608_v21 = vpop.xlane.xlu1 %607 }
 0x4f5   : > { %v612_v22 = vsub.f32 %v599_v14, %v608_v21 }
 0x4f6   : > { %v611_v23 = vpop.xlane.xlu0 %610 }
 0x4f7   : > { %v614_v24 = vmul.f32 1.442695, %v612_v22  ;;  %v613_v25 = vsub.f32 %v602_v17, %v611_v23 }
 0x4f9   : > { %2055 = vpow2.f32 %v614_v24  ;;  %v616_v26 = vmul.f32 1.442695, %v613_v25 }
 0x4fb   : > { %2057 = vpow2.f32 %v616_v26 }
 0x503   : > { %v2056_v27 = vpop.eup %2055 }
 0x504   : > { %v618_v28 = vsel %vm429_vm1, %v2056_v27, 0.0 }
 0x505   : > { %v2058_v29 = vpop.eup %2057  ;;  %619 = vadd.xlane.f32.xlu0 %v618_v28 }
 0x506   : > { %v621_v30 = vsel %vm429_vm1, %v2058_v29, 0.0 }
 0x507   : > { %622 = vadd.xlane.f32.xlu1 %v621_v30 }
 0x518   : > { %683 = vrot.lane.b32.xlu1 %v2524_v36, %s2280_s16 }
 0x51b   : > { %685 = vrot.lane.b32.xlu0 %v2526_v37, %s2280_s16 }
 0x592   : > { %v620_v31 = vpop.xlane.xlu0 %619 }
 0x593   : > { %v624_v32 = vmul.f32 11.313708, %v620_v31 }
 0x594   : > { %v623_v33 = vpop.xlane.xlu1 %622 }
 0x595   : > { %2059 = vrcp.f32 %v624_v32  ;;  %v625_v34 = vmul.f32 11.313708, %v623_v33 }
 0x596   : > { %v686_v47 = vpop.permute.xlu0 %685 }
 0x597   : > { %2061 = vrcp.f32 %v625_v34  ;;  %v691_v49 = vsel %vm429_vm1, %v686_v47, 0 }
 0x598   : > { %v684_v50 = vpop.permute.xlu1 %683 }
 0x59f   : > { %v2060_v35 = vpop.eup %2059 }
 0x5a0   : > { %v628_v38 = vmul.f32 %v2060_v35, %v624_v32 }
 0x5a1   : > { %v2062_v39 = vpop.eup %2061 }
 0x5a2   : > { %v630_v40 = vsub.f32 2.0, %v628_v38  ;;  %v629_v41 = vmul.f32 %v2062_v39, %v625_v34 }
 0x5a4   : > { %v632_v42 = vmul.f32 %v2060_v35, %v630_v40  ;;  %v631_v43 = vsub.f32 2.0, %v629_v41 }
 0x5a6   : > { %v633_v44 = vmul.f32 %v2062_v39, %v631_v43  ;;  %v634_v45 = vmul.f32 %v2056_v27, %v632_v42 }
 0x5a8   : > { %v635_v46 = vmul.f32 %v2058_v29, %v633_v44 }
 0x5aa   : > { %v636_v48 = vpack.c.bf16 %v635_v46, %v634_v45 }
 0x5ac   : > { %1837 = vmatmul.mubr.msk.bf16.vlgmr.msra.gmra.mrb[12].mxu1 %vm429_vm1, %v636_v48 }
 0x5ad   : > { %1841 = vmatpush3.bf16.xpose.msra.mxu1 %v691_v49  ;;  %1842 = vmatprep.mubr.msk.bf16.mxu1 %vm2278_vm0, %v2277_v20 }
 0x5ae   : > { %1846 = vmatprep.subr.bf16.mxu1 %v2277_v20 }
 0x5b4   : > { %1843 = vmatmul.mubr.msk.bf16.vlgmr.msra.gmra.mrb[16].mxu1 %vm429_vm1, %v684_v50 }
 0x5b5   : > { %1847 = vmatpush3.bf16.msra.mxu1 %v686_v47  ;;  %1848 = vmatprep.mubr.msk.bf16.mxu1 %vm2278_vm0, %v2277_v20 }
 0x5b6   : > { %1852 = vmatprep.subr.bf16.mxu1 %v2277_v20 }
 0x67f   : > { %v2577_v51 = vpop.f32.mrb[12].mxu1 }
 0x680   : > { %v1838_v52 = vpop.f32.mrb[13].mxu1 }
 0x681   : > { %v2579_v53 = vpop.f32.mrb[14].mxu1 }
 0x682   : > { %v682_v54 = vpack.c.bf16 %v2579_v53, %v2577_v51  ;;  %v1839_v55 = vpop.f32.mrb[15].mxu1 }
 0x687   : > { %v727_v56 = vpop.f32.mrb[16].mxu1 }
 0x688   : > { %v1844_v57 = vpop.f32.mrb[17].mxu1  ;;  %v734_v58 = vsel %vm429_vm1, %v727_v56, -inf }
 0x689   : > { %735 = vmax.xlane.f32.xlu1 %v734_v58  ;;  %v730_v59 = vpop.f32.mrb[18].mxu1 }
 0x68a   : > { %v1845_v60 = vpop.f32.mrb[19].mxu1  ;;  %v737_v61 = vsel %vm429_vm1, %v730_v59, -inf }
 0x68b   : > { %738 = vmax.xlane.f32.xlu0 %v737_v61 }
 0x716   : > { %v736_v62 = vpop.xlane.xlu1 %735 }
 0x717   : > { %v740_v63 = vsub.f32 %v727_v56, %v736_v62 }
 0x718   : > { %v739_v0 = vpop.xlane.xlu0 %738 }
 0x719   : > { %v742_v1 = vmul.f32 1.442695, %v740_v63  ;;  %v741_v2 = vsub.f32 %v730_v59, %v739_v0 }
 0x71b   : > { %2063 = vpow2.f32 %v742_v1  ;;  %v744_v3 = vmul.f32 1.442695, %v741_v2 }
 0x71d   : > { %2065 = vpow2.f32 %v744_v3 }
 0x725   : > { %v2064_v4 = vpop.eup %2063 }
 0x726   : > { %v746_v5 = vsel %vm429_vm1, %v2064_v4, 0.0 }
 0x727   : > { %v2066_v6 = vpop.eup %2065  ;;  %747 = vadd.xlane.f32.xlu0 %v746_v5 }
 0x728   : > { %v749_v7 = vsel %vm429_vm1, %v2066_v6, 0.0 }
 0x729   : > { %750 = vadd.xlane.f32.xlu1 %v749_v7 }
 0x73a   : > { %811 = vrot.lane.b32.xlu1 %v2524_v36, %s2281_s28 }
 0x73d   : > { %813 = vrot.lane.b32.xlu0 %v2526_v37, %s2281_s28 }
 0x73e   : > { %941 = vrot.lane.b32.xlu1 %v2526_v37, %s2282_s13 }
 0x741   : > { %1069 = vrot.lane.b32.xlu0 %v2526_v37, %s2283_s17 }
 0x742   : > { %939 = vrot.lane.b32.xlu1 %v2524_v36, %s2282_s13 }
 0x745   : > { %1197 = vrot.lane.b32.xlu0 %v2526_v37, %s2284_s11 }
 0x746   : > { %1067 = vrot.lane.b32.xlu1 %v2524_v36, %s2283_s17 }
 0x749   : > { %1325 = vrot.lane.b32.xlu0 %v2526_v37, %s2285_s29 }
 0x74a   : > { %1195 = vrot.lane.b32.xlu1 %v2524_v36, %s2284_s11 }
 0x74e   : > { %1323 = vrot.lane.b32.xlu1 %v2524_v36, %s2285_s29 }
 0x7b4   : > { %v748_v8 = vpop.xlane.xlu0 %747 }
 0x7b5   : > { %v752_v10 = vmul.f32 11.313708, %v748_v8 }
 0x7b6   : > { %v751_v13 = vpop.xlane.xlu1 %750 }
 0x7b7   : > { %2067 = vrcp.f32 %v752_v10  ;;  %v753_v14 = vmul.f32 11.313708, %v751_v13 }
 0x7b8   : > { %v814_v16 = vpop.permute.xlu0 %813 }
 0x7b9   : > { %2069 = vrcp.f32 %v753_v14  ;;  %v819_v33 = vsel %vm429_vm1, %v814_v16, 0 }
 0x7ba   : > { %v812_v15 = vpop.permute.xlu1 %811 }
 0x7bc   : > { %v2612_v23 = vpop.permute.xlu0 %1069 }
 0x7bd   : > { %v1075_v27 = vsel %vm429_vm1, %v2612_v23, 0 }
 0x7be   : > { %v2607_v17 = vpop.permute.xlu1 %941 }
 0x7bf   : > { %v947_v18 = vsel %vm429_vm1, %v2607_v17, 0 }
 0x7c0   : > { %1865 = vmatpush3.bf16.xpose.msra.mxu0 %v947_v18  ;;  %v2620_v32 = vpop.permute.xlu0 %1197 }
 0x7c1   : > { %v2068_v37 = vpop.eup %2067  ;;  %1876 = vmatprep.subr.bf16.mxu0 %v2277_v20  ;;  %v1203_v35 = vsel %vm429_vm1, %v2620_v32, 0 }
 0x7c2   : > { %v756_v19 = vmul.f32 %v2068_v37, %v752_v10  ;;  %v940_v26 = vpop.permute.xlu1 %939 }
 0x7c3   : > { %v2070_v21 = vpop.eup %2069 }
 0x7c4   : > { %v758_v36 = vsub.f32 2.0, %v756_v19  ;;  %v757_v22 = vmul.f32 %v2070_v21, %v753_v14  ;;  %v2633_v38 = vpop.permute.xlu0 %1325 }
 0x7c5   : > { %v1331_v40 = vsel %vm429_vm1, %v2633_v38, 0 }
 0x7c6   : > { %v760_v24 = vmul.f32 %v2068_v37, %v758_v36  ;;  %v759_v25 = vsub.f32 2.0, %v757_v22  ;;  %v1068_v34 = vpop.permute.xlu1 %1067 }
 0x7c7   : > { %1867 = vmatmul.mubr.msk.bf16.vlgmr.msra.gmra.mrb[4].mxu0 %vm429_vm1, %v940_v26 }
 0x7c8   : > { %v761_v28 = vmul.f32 %v2070_v21, %v759_v25  ;;  %1877 = vmatpush3.bf16.xpose.msra.mxu0 %v1075_v27  ;;  %1878 = vmatprep.mubr.msk.bf16.mxu0 %vm2278_vm0, %v2277_v20  ;;  %v762_v29 = vmul.f32 %v2064_v4, %v760_v24 }
 0x7c9   : > { %1888 = vmatprep.subr.bf16.mxu0 %v2277_v20 }
 0x7ca   : > { %v763_v30 = vmul.f32 %v2066_v6, %v761_v28  ;;  %v1196_v39 = vpop.permute.xlu1 %1195 }
 0x7cc   : > { %v764_v31 = vpack.c.bf16 %v763_v30, %v762_v29 }
 0x7ce   : > { %1849 = vmatmul.mubr.msk.bf16.vlgmr.msra.gmra.mrb[20].mxu1 %vm429_vm1, %v764_v31  ;;  %v1324_v41 = vpop.permute.xlu1 %1323 }
 0x7cf   : > { %1853 = vmatpush3.bf16.xpose.msra.mxu1 %v819_v33  ;;  %1879 = vmatmul.mubr.msk.bf16.vlgmr.msra.gmra.mrb[8].mxu0 %vm429_vm1, %v1068_v34 }
 0x7d0   : > { %1889 = vmatpush3.bf16.xpose.msra.mxu0 %v1203_v35  ;;  %1854 = vmatprep.mubr.msk.bf16.mxu1 %vm2278_vm0, %v2277_v20 }
 0x7d1   : > { %1858 = vmatprep.subr.bf16.mxu1 %v2277_v20  ;;  %1890 = vmatprep.mubr.msk.bf16.mxu0 %vm2278_vm0, %v2277_v20 }
 0x7d2   : > { %1900 = vmatprep.subr.bf16.mxu0 %v2277_v20 }
 0x7d6   : > { %1855 = vmatmul.mubr.msk.bf16.vlgmr.msra.gmra.mrb[24].mxu1 %vm429_vm1, %v812_v15 }
 0x7d7   : > { %1859 = vmatpush3.bf16.msra.mxu1 %v814_v16  ;;  %1891 = vmatmul.mubr.msk.bf16.vlgmr.msra.gmra.mrb[12].mxu0 %vm429_vm1, %v1196_v39 }
 0x7d8   : > { %1901 = vmatpush3.bf16.xpose.msra.mxu0 %v1331_v40  ;;  %1902 = vmatprep.mubr.msk.bf16.mxu0 %vm2278_vm0, %v2277_v20 }
 0x7d9   : > { %1860 = vmatprep.mubr.msk.bf16.mxu1 %vm2278_vm0, %v2277_v20  ;;  %1870 = vmatprep.subr.bf16.mxu1 %v2277_v20 }
 0x7da   : > { %1912 = vmatprep.subr.bf16.mxu0 %v2277_v20 }
 0x7df   : > { %1903 = vmatmul.mubr.msk.bf16.vlgmr.msra.gmra.mrb[16].mxu0 %vm429_vm1, %v1324_v41 }
 0x7e0   : > { %1928 = vmatprep.mubr.msk.bf16.mxu0 %vm2278_vm0, %v2277_v20 }
 0x89a   : > { %v983_v42 = vpop.f32.mrb[4].mxu0 }
 0x89b   : > { %v1868_v43 = vpop.f32.mrb[5].mxu0  ;;  %v990_v4 = vsel %vm429_vm1, %v983_v42, -inf }
 0x89c   : > { %v986_v44 = vpop.f32.mrb[6].mxu0 }
 0x89d   : > { %v1869_v45 = vpop.f32.mrb[7].mxu0  ;;  %v993_v7 = vsel %vm429_vm1, %v986_v44, -inf }
 0x8a1   : > { %v2648_v46 = vpop.f32.mrb[20].mxu1 }
 0x8a2   : > { %v1850_v47 = vpop.f32.mrb[21].mxu1  ;;  %v2650_v48 = vpop.f32.mrb[8].mxu0 }
 0x8a3   : > { %v2652_v49 = vpop.f32.mrb[22].mxu1  ;;  %v1880_v50 = vpop.f32.mrb[9].mxu0  ;;  %v1118_v15 = vsel %vm429_vm1, %v2650_v48, -inf }
 0x8a4   : > { %v810_v52 = vpack.c.bf16 %v2652_v49, %v2648_v46  ;;  %v1851_v55 = vpop.f32.mrb[23].mxu1  ;;  %v1114_v56 = vpop.f32.mrb[10].mxu0 }
 0x8a5   : > { %v1881_v57 = vpop.f32.mrb[11].mxu0  ;;  %v1121_v5 = vsel %vm429_vm1, %v1114_v56, -inf }
 0x8a9   : > { %v855_v58 = vpop.f32.mrb[24].mxu1 }
 0x8aa   : > { %v1856_v59 = vpop.f32.mrb[25].mxu1  ;;  %v2656_v60 = vpop.f32.mrb[12].mxu0  ;;  %v862_v61 = vsel %vm429_vm1, %v855_v58, -inf }
 0x8ab   : > { %v1892_v62 = vpop.f32.mrb[13].mxu0  ;;  %863 = vmax.xlane.f32.xlu0 %v862_v61  ;;  %v858_v63 = vpop.f32.mrb[26].mxu1  ;;  %v1246_v18 = vsel %vm429_vm1, %v2656_v60, -inf }
 0x8ac   : > { %v1857_v0 = vpop.f32.mrb[27].mxu1  ;;  %v1242_v1 = vpop.f32.mrb[14].mxu0  ;;  %v865_v2 = vsel %vm429_vm1, %v858_v63, -inf }
 0x8ad   : > { %v1893_v3 = vpop.f32.mrb[15].mxu0  ;;  %866 = vmax.xlane.f32.xlu1 %v865_v2  ;;  %v1249_v13 = vsel %vm429_vm1, %v1242_v1, -inf }
 0x8af   : > { %991 = vmax.xlane.f32.xlu0 %v990_v4 }
 0x8b1   : > { %1122 = vmax.xlane.f32.xlu1 %v1121_v5 }
 0x8b2   : > { %v2662_v6 = vpop.f32.mrb[16].mxu0 }
 0x8b3   : > { %v1904_v8 = vpop.f32.mrb[17].mxu0  ;;  %994 = vmax.xlane.f32.xlu0 %v993_v7  ;;  %v1374_v37 = vsel %vm429_vm1, %v2662_v6, -inf }
 0x8b4   : > { %v1370_v10 = vpop.f32.mrb[18].mxu0 }
 0x8b5   : > { %v1905_v14 = vpop.f32.mrb[19].mxu0  ;;  %1250 = vmax.xlane.f32.xlu1 %v1249_v13  ;;  %v1377_v16 = vsel %vm429_vm1, %v1370_v10, -inf }
 0x8b7   : > { %1119 = vmax.xlane.f32.xlu0 %v1118_v15 }
 0x8b9   : > { %1378 = vmax.xlane.f32.xlu1 %v1377_v16 }
 0x8bb   : > { %1247 = vmax.xlane.f32.xlu0 %v1246_v18 }
 0x8bf   : > { %1375 = vmax.xlane.f32.xlu0 %v1374_v37 }
 0x938   : > { %v864_v19 = vpop.xlane.xlu0 %863 }
 0x939   : > { %v868_v21 = vsub.f32 %v855_v58, %v864_v19 }
 0x93a   : > { %v867_v36 = vpop.xlane.xlu1 %866 }
 0x93b   : > { %v870_v22 = vmul.f32 1.442695, %v868_v21  ;;  %v869_v24 = vsub.f32 %v858_v63, %v867_v36 }
 0x93c   : > { %v992_v25 = vpop.xlane.xlu0 %991 }
 0x93d   : > { %2071 = vpow2.f32 %v870_v22  ;;  %v872_v26 = vmul.f32 1.442695, %v869_v24  ;;  %v996_v27 = vsub.f32 %v983_v42, %v992_v25 }
 0x93e   : > { %v1123_v28 = vpop.xlane.xlu1 %1122 }
 0x93f   : > { %2073 = vpow2.f32 %v872_v26  ;;  %v998_v29 = vmul.f32 1.442695, %v996_v27  ;;  %v1125_v30 = vsub.f32 %v1114_v56, %v1123_v28 }
 0x940   : > { %v995_v31 = vpop.xlane.xlu0 %994 }
 0x941   : > { %2075 = vpow2.f32 %v998_v29  ;;  %v997_v33 = vsub.f32 %v986_v44, %v995_v31  ;;  %v1128_v35 = vmul.f32 1.442695, %v1125_v30 }
 0x942   : > { %v1251_v34 = vpop.xlane.xlu1 %1250 }
 0x943   : > { %v1000_v39 = vmul.f32 1.442695, %v997_v33  ;;  %v1253_v40 = vsub.f32 %v1242_v1, %v1251_v34 }
 0x944   : > { %v1120_v41 = vpop.xlane.xlu0 %1119 }
 0x945   : > { %2077 = vpow2.f32 %v1000_v39  ;;  %v1124_v43 = vsub.f32 %v2650_v48, %v1120_v41  ;;  %v1256_v42 = vmul.f32 1.442695, %v1253_v40 }
 0x946   : > { %v1379_v45 = vpop.xlane.xlu1 %1378  ;;  %2079 = vpow2.f32 %v1128_v35 }
 0x947   : > { %v2674_v47 = vpop.eup %2071  ;;  %v1126_v50 = vmul.f32 1.442695, %v1124_v43  ;;  %v1381_v55 = vsub.f32 %v1370_v10, %v1379_v45 }
 0x948   : > { %v1248_v57 = vpop.xlane.xlu0 %1247  ;;  %v874_v56 = vsel %vm429_vm1, %v2674_v47, 0.0 }
 0x949   : > { %v2678_v44 = vpop.eup %2073  ;;  %2081 = vpow2.f32 %v1126_v50  ;;  %v1252_v58 = vsub.f32 %v2656_v60, %v1248_v57  ;;  %875 = vadd.xlane.f32.xlu0 %v874_v56  ;;  %v1384_v61 = vmul.f32 1.442695, %v1381_v55 }
 0x94a   : > { %v877_v48 = vsel %vm429_vm1, %v2678_v44, 0.0  ;;  %2083 = vpow2.f32 %v1256_v42 }
 0x94b   : > { %v2683_v59 = vpop.eup %2075  ;;  %v1254_v62 = vmul.f32 1.442695, %v1252_v58  ;;  %878 = vadd.xlane.f32.xlu1 %v877_v48 }
 0x94c   : > { %v1376_v63 = vpop.xlane.xlu0 %1375  ;;  %v1002_v0 = vsel %vm429_vm1, %v2683_v59, 0.0 }
 0x94d   : > { %2085 = vpow2.f32 %v1254_v62  ;;  %v1380_v1 = vsub.f32 %v2662_v6, %v1376_v63  ;;  %1003 = vadd.xlane.f32.xlu0 %v1002_v0 }
 0x94e   : > { %2087 = vpow2.f32 %v1384_v61 }
 0x94f   : > { %v2688_v2 = vpop.eup %2077  ;;  %v1382_v60 = vmul.f32 1.442695, %v1380_v1 }
 0x950   : > { %v1005_v3 = vsel %vm429_vm1, %v2688_v2, 0.0  ;;  %v2692_v4 = vpop.eup %2079 }
 0x951   : > { %2089 = vpow2.f32 %v1382_v60  ;;  %1006 = vadd.xlane.f32.xlu1 %v1005_v3  ;;  %v1133_v6 = vsel %vm429_vm1, %v2692_v4, 0.0 }
 0x953   : > { %v2694_v5 = vpop.eup %2081 }
 0x954   : > { %v1130_v7 = vsel %vm429_vm1, %v2694_v5, 0.0  ;;  %v2700_v8 = vpop.eup %2083 }
 0x955   : > { %1131 = vadd.xlane.f32.xlu0 %v1130_v7  ;;  %1134 = vadd.xlane.f32.xlu1 %v1133_v6  ;;  %v1261_v14 = vsel %vm429_vm1, %v2700_v8, 0.0 }
 0x957   : > { %v2702_v10 = vpop.eup %2085 }
 0x958   : > { %v1258_v13 = vsel %vm429_vm1, %v2702_v10, 0.0  ;;  %v2708_v15 = vpop.eup %2087 }
 0x959   : > { %1259 = vadd.xlane.f32.xlu0 %v1258_v13  ;;  %1262 = vadd.xlane.f32.xlu1 %v1261_v14  ;;  %v1389_v37 = vsel %vm429_vm1, %v2708_v15, 0.0 }
 0x95b   : > { %v2710_v16 = vpop.eup %2089 }
 0x95c   : > { %v1386_v18 = vsel %vm429_vm1, %v2710_v16, 0.0 }
 0x95d   : > { %1387 = vadd.xlane.f32.xlu0 %v1386_v18  ;;  %1390 = vadd.xlane.f32.xlu1 %v1389_v37 }
 0x96e   : > { %1455 = vrot.lane.b32.xlu1 %v810_v52, %s2284_s11 }
 0x973   : > { %1452 = vrot.lane.b32.xlu0 %v682_v54, %s2285_s29 }
 0x9d6   : > { %v876_v19 = vpop.xlane.xlu0 %875 }
 0x9d7   : > { %v880_v21 = vmul.f32 11.313708, %v876_v19 }
 0x9d8   : > { %v879_v36 = vpop.xlane.xlu1 %878 }
 0x9d9   : > { %2091 = vrcp.f32 %v880_v21  ;;  %v881_v22 = vmul.f32 11.313708, %v879_v36 }
 0x9da   : > { %v1004_v24 = vpop.xlane.xlu0 %1003 }
 0x9db   : > { %2093 = vrcp.f32 %v881_v22  ;;  %v1008_v25 = vmul.f32 11.313708, %v1004_v24 }
 0x9dd   : > { %2095 = vrcp.f32 %v1008_v25 }
 0x9de   : > { %v1007_v26 = vpop.xlane.xlu1 %1006 }
 0x9df   : > { %v1009_v27 = vmul.f32 11.313708, %v1007_v26 }
 0x9e1   : > { %2097 = vrcp.f32 %v1009_v27 }
 0x9e2   : > { %v1132_v28 = vpop.xlane.xlu0 %1131  ;;  %v1135_v46 = vpop.xlane.xlu1 %1134 }
 0x9e3   : > { %v2092_v49 = vpop.eup %2091  ;;  %v1136_v52 = vmul.f32 11.313708, %v1132_v28  ;;  %v1137_v29 = vmul.f32 11.313708, %v1135_v46 }
 0x9e4   : > { %v884_v30 = vmul.f32 %v2092_v49, %v880_v21 }
 0x9e5   : > { %v2094_v51 = vpop.eup %2093  ;;  %2099 = vrcp.f32 %v1136_v52 }
 0x9e6   : > { %v886_v53 = vsub.f32 2.0, %v884_v30  ;;  %v885_v54 = vmul.f32 %v2094_v51, %v881_v22  ;;  %2101 = vrcp.f32 %v1137_v29  ;;  %v1260_v31 = vpop.xlane.xlu0 %1259  ;;  %v1263_v33 = vpop.xlane.xlu1 %1262 }
 0x9e7   : > { %v2096_v34 = vpop.eup %2095  ;;  %v1264_v35 = vmul.f32 11.313708, %v1260_v31  ;;  %v1265_v39 = vmul.f32 11.313708, %v1263_v33 }
 0x9e8   : > { %v888_v40 = vmul.f32 %v2092_v49, %v886_v53  ;;  %v887_v41 = vsub.f32 2.0, %v885_v54  ;;  %v1012_v43 = vmul.f32 %v2096_v34, %v1008_v25 }
 0x9e9   : > { %2103 = vrcp.f32 %v1264_v35 }
 0x9ea   : > { %v889_v45 = vmul.f32 %v2094_v51, %v887_v41  ;;  %2105 = vrcp.f32 %v1265_v39  ;;  %v1388_v42 = vpop.xlane.xlu0 %1387  ;;  %v1391_v50 = vpop.xlane.xlu1 %1390  ;;  %v890_v57 = vmul.f32 %v2674_v47, %v888_v40  ;;  %v1014_v58 = vsub.f32 2.0, %v1012_v43  ;;  %v2042_v41 = vld [vmem:[#allocation7 + $0x18] sm:$0xff]  }
 0x9eb   : > { %v2098_v55 = vpop.eup %2097  ;;  %v1392_v61 = vmul.f32 11.313708, %v1388_v42  ;;  %v1393_v62 = vmul.f32 11.313708, %v1391_v50 }
 0x9ec   : > { %v891_v56 = vmul.f32 %v2678_v44, %v889_v45  ;;  %v1013_v48 = vmul.f32 %v2098_v55, %v1009_v27  ;;  %v1016_v3 = vmul.f32 %v2096_v34, %v1014_v58  ;;  %v2040_v34 = vld [vmem:[#allocation7 + $0x8] sm:$0xff]   ;;  %v2043_v45 = vld [vmem:[#allocation7 + $0x20] sm:$0xff]  }
 0x9ed   : > { %2107 = vrcp.f32 %v1392_v61 }
 0x9ee   : > { %v892_v63 = vpack.c.bf16 %v891_v56, %v890_v57  ;;  %v1015_v0 = vsub.f32 2.0, %v1013_v48  ;;  %2109 = vrcp.f32 %v1393_v62  ;;  %v1018_v19 = vmul.f32 %v2683_v59, %v1016_v3  ;;  %v2045_v48 = vld [vmem:[#allocation7 + $0x30] sm:$0xff]  }
 0x9ef   : > { %v2100_v1 = vpop.eup %2099 }
 0x9f0   : > { %v2102_v60 = vpop.eup %2101  ;;  %v1017_v7 = vmul.f32 %v2098_v55, %v1015_v0  ;;  %v1140_v6 = vmul.f32 %v2100_v1, %v1136_v52  ;;  %1861 = vmatmul.mubr.msk.bf16.vlgmr.msra.gmra.mrb[28].mxu1 %vm429_vm1, %v892_v63  ;;  %v2044_v55 = vld [vmem:[#allocation7 + $0x28] sm:$0xff]   ;;  %v2046_v63 = vld [vmem:[#allocation7 + $0x38] sm:$0xff]  }
 0x9f1   : > { %v1141_v13 = vmul.f32 %v2102_v60, %v1137_v29  ;;  %1871 = vmatpush3.bf16.msra.mxu1 %v2607_v17  ;;  %1872 = vmatprep.mubr.msk.bf16.mxu1 %vm2278_vm0, %v2277_v20 }
 0x9f2   : > { %v1019_v47 = vmul.f32 %v2688_v2, %v1017_v7  ;;  %v1142_v44 = vsub.f32 2.0, %v1140_v6  ;;  %1882 = vmatprep.subr.bf16.mxu1 %v2277_v20 }
 0x9f3   : > { %v2104_v14 = vpop.eup %2103  ;;  %v1143_v18 = vsub.f32 2.0, %v1141_v13 }
 0x9f4   : > { %v2106_v37 = vpop.eup %2105  ;;  %v1268_v21 = vmul.f32 %v2104_v14, %v1264_v35  ;;  %v1020_v36 = vpack.c.bf16 %v1019_v47, %v1018_v19  ;;  %v1144_v22 = vmul.f32 %v2100_v1, %v1142_v44  ;;  %v1456_v19 = vpop.permute.xlu1 %1455 }
 0x9f5   : > { %v1145_v24 = vmul.f32 %v2102_v60, %v1143_v18  ;;  %v1269_v25 = vmul.f32 %v2106_v37, %v1265_v39 }
 0x9f6   : > { %v1270_v17 = vsub.f32 2.0, %v1268_v21  ;;  %v1146_v26 = vmul.f32 %v2694_v5, %v1144_v22 }
 0x9f7   : > { %v2108_v2 = vpop.eup %2107  ;;  %v1147_v27 = vmul.f32 %v2692_v4, %v1145_v24  ;;  %v1271_v28 = vsub.f32 2.0, %v1269_v25 }
 0x9f8   : > { %1873 = vmatmul.mubr.msk.bf16.vlgmr.msra.gmra.mrb[32].mxu1 %vm429_vm1, %v1020_v36  ;;  %v2110_v59 = vpop.eup %2109  ;;  %v1272_v46 = vmul.f32 %v2104_v14, %v1270_v17  ;;  %v1396_v29 = vmul.f32 %v2108_v2, %v1392_v61 }
 0x9f9   : > { %1883 = vmatpush3.bf16.msra.mxu1 %v2612_v23  ;;  %1884 = vmatprep.mubr.msk.bf16.mxu1 %vm2278_vm0, %v2277_v20  ;;  %v1148_v49 = vpack.c.bf16 %v1147_v27, %v1146_v26  ;;  %v1273_v52 = vmul.f32 %v2106_v37, %v1271_v28  ;;  %v1397_v30 = vmul.f32 %v2110_v59, %v1393_v62 }
 0x9fa   : > { %1894 = vmatprep.subr.bf16.mxu1 %v2277_v20  ;;  %v1274_v23 = vmul.f32 %v2702_v10, %v1272_v46  ;;  %v1398_v5 = vsub.f32 2.0, %v1396_v29 }
 0x9fb   : > { %v1275_v4 = vmul.f32 %v2700_v8, %v1273_v52  ;;  %v1399_v51 = vsub.f32 2.0, %v1397_v30  ;;  %v2039_v8 = vld [vmem:[#allocation7] sm:$0xff]  }
 0x9fc   : > { %v1400_v54 = vmul.f32 %v2108_v2, %v1398_v5  ;;  %1913 = vmatpush3.bf16.msra.mxu0 %v2039_v8 }
 0x9fd   : > { %v1276_v53 = vpack.c.bf16 %v1275_v4, %v1274_v23  ;;  %v1401_v31 = vmul.f32 %v2110_v59, %v1399_v51  ;;  %1914 = vmatprep.subr.bf16.mxu0 %v2277_v20 }
 0x9ff   : > { %v1403_v10 = vmul.f32 %v2708_v15, %v1401_v31 }
 0xa00   : > { %1885 = vmatmul.mubr.msk.bf16.vlgmr.msra.gmra.mrb[36].mxu1 %vm429_vm1, %v1148_v49  ;;  %1915 = vmatpush3.bf16.msra.mxu0 %v2040_v34 }
 0xa01   : > { %1895 = vmatpush3.bf16.msra.mxu1 %v2620_v32  ;;  %1896 = vmatprep.mubr.msk.bf16.mxu1 %vm2278_vm0, %v2277_v20  ;;  %v1402_v32 = vmul.f32 %v2710_v16, %v1400_v54 }
 0xa02   : > { %1906 = vmatprep.subr.bf16.mxu1 %v2277_v20  ;;  %1916 = vmatprep.subr.bf16.mxu0 %v2277_v20 }
 0xa03   : > { %v1404_v33 = vpack.c.bf16 %v1403_v10, %v1402_v32 }
 0xa08   : > { %1897 = vmatmul.mubr.msk.bf16.vlgmr.msra.gmra.mrb[40].mxu1 %vm429_vm1, %v1276_v53 }
 0xa09   : > { %1907 = vmatpush3.bf16.msra.mxu1 %v2633_v38  ;;  %1908 = vmatprep.mubr.msk.bf16.mxu1 %vm2278_vm0, %v2277_v20  ;;  %v2041_v38 = vld [vmem:[#allocation7 + $0x10] sm:$0xff]  }
 0xa0a   : > { %1917 = vmatpush3.bf16.msra.mxu0 %v2041_v38 }
 0xa0b   : > { %1918 = vmatprep.subr.bf16.mxu0 %v2277_v20 }
 0xa0e   : > { %1919 = vmatpush3.bf16.msra.mxu0 %v2042_v41 }
 0xa0f   : > { %1920 = vmatprep.subr.bf16.mxu0 %v2277_v20 }
 0xa10   : > { %1909 = vmatmul.mubr.msk.bf16.vlgmr.msra.gmra.mrb[44].mxu1 %vm429_vm1, %v1404_v33 }
 0xa12   : > { %1921 = vmatpush3.bf16.msra.mxu0 %v2043_v45 }
 0xa13   : > { %1922 = vmatprep.subr.bf16.mxu0 %v2277_v20 }
 0xa16   : > { %1923 = vmatpush3.bf16.msra.mxu0 %v2044_v55 }
 0xa17   : > { %1924 = vmatprep.subr.bf16.mxu0 %v2277_v20 }
 0xa1a   : > { %1925 = vmatpush3.bf16.msra.mxu0 %v2045_v48 }
 0xa1b   : > { %1926 = vmatprep.subr.bf16.mxu0 %v2277_v20  ;;  %v1453_v20 = vpop.permute.xlu0 %1452 }
 0xa1c   : > { %v1474_v36 = vsel %vm429_vm1, %v552_v12, %v1453_v20 }
 0xa1d   : > { %v1477_v24 = vsel %vm1475_vm2, %v1474_v36, %v1456_v19 }
 0xa1e   : > { %1927 = vmatpush3.bf16.msra.mxu0 %v2046_v63 }
 0xac3   : > { %v931_v35 = vpop.f32.mrb[28].mxu1 }
 0xac4   : > { %v1862_v39 = vpop.f32.mrb[29].mxu1 }
 0xac5   : > { %v934_v40 = vpop.f32.mrb[30].mxu1 }
 0xac6   : > { %v938_v16 = vpack.c.bf16 %v934_v40, %v931_v35  ;;  %v1863_v43 = vpop.f32.mrb[31].mxu1 }
 0xac8   : > { %1458 = vrot.lane.b32.xlu1 %v938_v16, %s2283_s17 }
 0xacb   : > { %v1059_v15 = vpop.f32.mrb[32].mxu1 }
 0xacc   : > { %v1874_v42 = vpop.f32.mrb[33].mxu1 }
 0xacd   : > { %v1062_v50 = vpop.f32.mrb[34].mxu1 }
 0xace   : > { %v1066_v57 = vpack.c.bf16 %v1062_v50, %v1059_v15  ;;  %v1875_v56 = vpop.f32.mrb[35].mxu1 }
 0xad0   : > { %1461 = vrot.lane.b32.xlu1 %v1066_v57, %s2282_s13 }
 0xad3   : > { %v1187_v58 = vpop.f32.mrb[36].mxu1 }
 0xad4   : > { %v1886_v61 = vpop.f32.mrb[37].mxu1 }
 0xad5   : > { %v1190_v62 = vpop.f32.mrb[38].mxu1 }
 0xad6   : > { %v1194_v0 = vpack.c.bf16 %v1190_v62, %v1187_v58  ;;  %v1887_v1 = vpop.f32.mrb[39].mxu1 }
 0xad8   : > { %1464 = vrot.lane.b32.xlu0 %v1194_v0, %s2281_s28 }
 0xadb   : > { %v1315_v60 = vpop.f32.mrb[40].mxu1 }
 0xadc   : > { %v1898_v3 = vpop.f32.mrb[41].mxu1 }
 0xadd   : > { %v1318_v7 = vpop.f32.mrb[42].mxu1 }
 0xade   : > { %v1322_v6 = vpack.c.bf16 %v1318_v7, %v1315_v60  ;;  %v1899_v13 = vpop.f32.mrb[43].mxu1 }
 0xae0   : > { %1467 = vrot.lane.b32.xlu1 %v1322_v6, %s2280_s16  ;;  %s2286_s16 = smov [#allocation8]  }
 0xae1   : > { %s2201_s28 = sshll.u32 %s2286_s16, 4  ;;  %s2202_s28 = int_to_ptr.vmem [resolvable:$false] %s2201_s28 }
 0xae2   : > { %s2203_s13 = scalar_lea.vmem %s2202_s28, 512  ;;  %p2204_p5 = scmp.lt.s32.totalorder %s2776_s10, %s2202_s28 }
 0xae3   : > { %v1443_v47 = vpop.f32.mrb[44].mxu1  ;;  %p2205_p9 = scmp.lt.s32.totalorder %s2203_s13, %s2197_s22 }
 0xae4   : > { %v1910_v44 = vpop.f32.mrb[45].mxu1 }
 0xae5   : > { %v1446_v14 = vpop.f32.mrb[46].mxu1  ;;  %p2206_p12 = por %p2205_p9, %p2204_p5 }
 0xae6   : > { %v1450_v18 = vpack.c.bf16 %v1446_v14, %v1443_v47  ;;  %v1911_v37 = vpop.f32.mrb[47].mxu1 }
 0xae7   : > { %p2207_p1 = pnand %p2206_p12, %p2200_p3 }
 0xae8   : > { %1470 = vrot.lane.b32.xlu0 %v1450_v18, %s2279_s15  ;;  %s2781_s15 = scalar_lea.hbm %s2830_s5, %s1774_s14 }
 0xb3a   : > { %v1459_v21 = vpop.permute.xlu1 %1458 }
 0xb3b   : > { %v1480_v17 = vsel %vm1478_vm3, %v1477_v24, %v1459_v21 }
 0xb42   : > { %v1462_v22 = vpop.permute.xlu1 %1461 }
 0xb43   : > { %v1483_v26 = vsel %vm1481_vm4, %v1480_v17, %v1462_v22 }
 0xb4a   : > { %v1465_v25 = vpop.permute.xlu0 %1464 }
 0xb4b   : > { %v1486_v27 = vsel %vm1484_vm5, %v1483_v26, %v1465_v25 }
 0xb52   : > { %v1468_v2 = vpop.permute.xlu1 %1467 }
 0xb53   : > { %v1489_v28 = vsel %vm1487_vm6, %v1486_v27, %v1468_v2 }
 0xb5a   : > { %v1471_v59 = vpop.permute.xlu0 %1470 }
 0xb5b   : > { %v1492_v9 = vsel %vm1490_vm7, %v1489_v28, %v1471_v59 }
 0xb5c   : > { %1929 = vmatmul.mubr.bf16.vlgmr.msra.gmra.mrb[20].mxu0 %v1492_v9 }
 0xc2f   : > { %v1599_v12 = vpop.f32.mrb[20].mxu0 }
 0xc30   : > { %v1600_v46 = vadd.f32 %v1759_v11, %v1599_v12  ;;  %v1930_v49 = vpop.f32.mrb[21].mxu0 }
 0xc31   : > { %v1602_v52 = vpop.f32.mrb[22].mxu0 }
 0xc32   : > { %1606 = vst [vmem:[%s271_s9] sm:$0xff] %v1600_v46  ;;  %v1603_v29 = vadd.f32 %v1759_v11, %v1602_v52  ;;  %v1931_v30 = vpop.f32.mrb[23].mxu0 }
 0xc34   : > { %1607 = vst [vmem:[%s271_s9 + $0x8] sm:$0xff] %v1603_v29 }
 0xc35   : > { %2210 = shalt.err (!%p2207_p1)
}
 0xc36   : > { %s2211_s17 = scalar_lea.hbm %s2781_s15, 256  ;;  %s2215_s12 = scalar_lea.hbm %s2830_s5, 512 }
 0xc37   : > { %p2212_p13 = scmp.ne.s32.totalorder %s2781_s15, %s2211_s17  ;;  %p2216_p4 = scmp.lt.u32.totalorder %s2781_s15, %s2830_s5 }
 0xc38   : > { %p2217_p7 = scmp.lt.u32.totalorder %s2215_s12, %s2211_s17  ;;  %p2219_p11 = scmp.lt.u32.totalorder %s2211_s17, %s2781_s15 }
 0xc39   : > { %p2213_p6 = pnand %p2212_p13, %p2844_p0 }
 0xc3a   : > { %p2218_p8 = por %p2217_p7, %p2216_p4 }
 0xc3b   : > { %p2214_p10 = pneg %p2213_p6 }
 0xc3c   : > { %p2220_p2 = por %p2219_p11, %p2218_p8 }
 0xc3e   : > { %p2221_p3 = pnand %p2220_p2, %p2214_p10 }
 0xc40   : > { %2224 = shalt.err (!%p2221_p3)
}
 0xc41   : > { %s2287_s14 = smov 128   ;;  %s2288_s24 = smov 8  }
 0xc42   : > { %1942 = dma.vmem_to_hbm [thread:$0]  (%p2844_p0), %s2776_s10, 256, %s2781_s15, %s1609_s6, %s2287_s14, %s2287_s14, %s2288_s24  }
 0xc43 PF: > { %s1637_s26 = sand.u32 1, %s2255_s18   ;;  %p2845_p5 = scmp.ne.s32.totalorder %s2835_s25, 0 }
 0xc44   : > { %p2846_p9 = scmp.ge.s32.totalorder %s2267_s21, 2  ;;  %s1638_s22 = scalar_lea.sflag [#allocation4], %s1637_s26 }
 0xc46   : > { %p1956_p12 = pnand %p2846_p9, %p2845_p5 }
 0xc48   : > { %2250 = dma.done.wait (!%p1956_p12), %s1638_s22, 256  }
 0xc49   : > { %2252 = vsyncadd (!%p1956_p12), %s1638_s22, 4294967040  ;;  %p19_p1 = scmp.ge.s32.totalorder %s2432_s23, 4   ;;  %s2847_s18 = smov %s2259_s19 }
 0xc4a   : > { %s2848_s19 = smov %s2263_s20  ;;  %s2849_s20 = smov %s2441_s7 }
 0xc4b   : > { %s2850_s21 = smov %s2432_s23  ;;  %21 = sbr.rel (!%p19_p1) target bundleno = 6 (0x6), region = 93 }
 0xc52   :  { %1643 = vsyncpa [#allocation3], 1 }
 0xc53   :  { %1645 = vsyncpa [#allocation3 + $0x1], 1 }
 0xc54   :  { %1646 = vsyncpa [#allocation6], 1 }
 0xc55   :  { %1647 = vsyncpa [#allocation4], 1 }
 0xc56   :  { %1649 = vsyncpa [#allocation4 + $0x1], 1 }

</bundles_post_ra>
